<compile_context>
chip_gen: v6e
topology: v6e:2x2x1
jax: 0.10.0
libtpu: 0.0.40
codegen_flags: <defaults>
</compile_context>

<pallas_src>
import numpy as np
import jax
import jax.numpy as jnp
from jax import lax
from jax.experimental import pallas as pl
from jax.experimental.pallas import tpu as pltpu


def _round_up(x, m):
    return (x + m - 1) // m * m


def _prefer_im2col():
    # v6e/v7x: 256-deep MXU -> the K*Cp im2col packs the contraction.
    # v5e and older: 128-deep MXU -> K accumulated (T,Cp)x(Cp,Cp) dots give
    # identical MXU passes with far less vector-store pressure.
    try:
        kind = jax.devices()[0].device_kind.lower()
    except Exception:
        return True
    for tag in ("v2", "v3", "v4", "v5"):
        if tag in kind:
            return False
    return True


# ----------------------------------------------------------------------------
# Fused ResBlock kernel: all outer layers, one (batch, time-tile) per step.
# ----------------------------------------------------------------------------
def make_resblock_kernel(T, TILE_T, Text, Cp, K, dilations_all, slope,
                         off, RLp, pad_rows, use_im2col):
    n_inner = sum(len(d) for d in dilations_all)
    tail = pad_rows - (off + Text)

    def kernel(*refs):
        x_ref = refs[0]                               # (1, 1, Text, Cp) f32
        w_refs = refs[1:1 + n_inner]                  # (K*Cp, Cp) bf16 each
        b_refs = refs[1 + n_inner:1 + 2 * n_inner]    # (1, Cp)    f32  each
        o_ref = refs[1 + 2 * n_inner]                 # (1, TILE_T, Cp) f32
        resid, pad_a = refs[2 + 2 * n_inner:]         # scratch

        t = pl.program_id(1)

        # Zero ONLY the halo rows of the shared pad scratch; interior rows are
        # overwritten by the first LeakyReLU store.  Unconditional: scratch is
        # per-core under "parallel" megacore sharding.
        pad_a[pl.ds(0, off), :] = jnp.zeros((off, Cp), jnp.float32)
        if tail > 0:
            pad_a[pl.ds(off + Text, tail), :] = jnp.zeros((tail, Cp),
                                                          jnp.float32)

        # Window rows outside the true sequence [0, T) must look like zeros to
        # EVERY conv ('same' zero padding), so mask each conv input with this
        # per-tile validity mask.
        row = lax.broadcasted_iota(jnp.int32, (Text, 1), 0)
        g = row + (t * TILE_T - RLp)          # global row index of window rows
        valid = (g >= 0) & (g < T)

        idx = 0
        first = True
        for dils in dilations_all:                    # outer residual layers
            h = x_ref[0, 0] if first else resid[...]  # (Text, Cp) f32
            for d in dils:                            # inner LeakyReLU + conv
                w_ref = w_refs[idx]
                b_ref = b_refs[idx]
                idx += 1
                left = d * (K - 1) // 2               # PyTorch 'same' rule

                a = jnp.where(h > 0, h, slope * h)    # LeakyReLU (f32)
                a = jnp.where(valid, a, 0.0)          # boundary zero padding
                pad_a[pl.ds(off, Text), :] = a        # aligned store (off%8==0)

                if use_im2col:
                    # K shifted taps, cast to bf16 BEFORE the concat (no f32
                    # im2col materialization), one (Text, K*Cp)x(K*Cp, Cp) dot.
                    taps = [pad_a[pl.ds(off - left + k * d, Text), :]
                            .astype(jnp.bfloat16) for k in range(K)]
                    im2col = jnp.concatenate(taps, axis=-1)
                    h = jnp.dot(im2col, w_ref[...],
                                preferred_element_type=jnp.float32) + b_ref[...]
                else:
                    # v5e path: K accumulated (Text,Cp)x(Cp,Cp) dots, no concat.
                    acc = jnp.zeros((Text, Cp), jnp.float32)
                    for k in range(K):
                        tap = pad_a[pl.ds(off - left + k * d, Text), :]
                        acc = acc + jnp.dot(tap.astype(jnp.bfloat16),
                                            w_ref[pl.ds(k * Cp, Cp), :],
                                            preferred_element_type=jnp.float32)
                    h = acc + b_ref[...]

            if first:
                resid[...] = x_ref[0, 0] + h          # residual add (layer 1)
                first = False
            else:
                resid[...] = resid[...] + h           # residual add

        # Write back only the central TILE_T rows (halo rows are scrap).
        o_ref[0] = resid[pl.ds(RLp, TILE_T), :]

    return kernel


# ----------------------------------------------------------------------------
# Wrapper: layout / halo-tiling glue + pallas_call.
# ----------------------------------------------------------------------------
def resblock_forward(x_nct, params_pallas, K, dilations_all, slope,
                     tile_t=None, use_im2col=None):
    """x_nct: (B, C, T) f32 (PyTorch Conv1d layout). Returns (B, C, T) f32."""
    B, C, T = x_nct.shape
    if use_im2col is None:
        use_im2col = _prefer_im2col()

    Cp = _round_up(max(C, 128), 128)          # lane-dense channel dimension
    n_inner = sum(len(d) for d in dilations_all)

    # Receptive-field / pad geometry.
    all_d = [d for dils in dilations_all for d in dils]
    max_left = max(d * (K - 1) // 2 for d in all_d)
    max_right = max(d * (K - 1) - d * (K - 1) // 2 for d in all_d)
    RL = sum(d * (K - 1) // 2 for d in all_d)            # total left halo
    RR = sum(d * (K - 1) - d * (K - 1) // 2 for d in all_d)  # total right halo

    # Time tiling.
    if tile_t is None:
        tile_t = min(_round_up(T, 8), 2048)
    TILE_T = _round_up(min(tile_t, _round_up(T, 8)), 8)
    Tp = _round_up(T, TILE_T)
    n_t = Tp // TILE_T
    RLp = _round_up(RL, 8)                     # aligned central-region offset
    Text = _round_up(TILE_T + RLp + RR, 8)     # extended (halo'd) window rows

    off = _round_up(max(max_left, 8), 8)       # aligned activation store
    pad_rows = _round_up(off + Text + max_right, 8)

    # (B, C, T) -> (B, T, Cp) -> zero-framed padded sequence -> overlapping
    # halo'd tiles (B, n_t, Text, Cp).  Zero-padded channels stay exactly zero
    # through LeakyReLU / conv (zero-padded weights) / residual adds.
    x_btc = jnp.transpose(x_nct, (0, 2, 1)).astype(jnp.float32)
    if Cp > C:
        x_btc = jnp.pad(x_btc, ((0, 0), (0, 0), (0, Cp - C)))
    Lin = (n_t - 1) * TILE_T + Text
    x_pad = jnp.zeros((B, Lin, Cp), jnp.float32).at[:, RLp:RLp + T, :].set(x_btc)
    x_tiles = jnp.stack([x_pad[:, t * TILE_T:t * TILE_T + Text, :]
                         for t in range(n_t)], axis=1)

    # Stack + pad + bf16-cast the weights; pad the biases.
    w_list, b_list = [], []
    for inner in params_pallas:
        for w_kcc, b_c in inner:              # w_kcc: (K, C_in, C_out) f32
            w_pad = jnp.zeros((K, Cp, Cp), jnp.float32).at[:, :C, :C].set(w_kcc)
            w_list.append(w_pad.reshape(K * Cp, Cp).astype(jnp.bfloat16))
            b_list.append(jnp.zeros((1, Cp), jnp.float32).at[0, :C].set(b_c))

    kernel = make_resblock_kernel(T, TILE_T, Text, Cp, K, dilations_all, slope,
                                  off, RLp, pad_rows, use_im2col)

    in_specs = [pl.BlockSpec((1, 1, Text, Cp), lambda b, t: (b, t, 0, 0))]
    in_specs += [pl.BlockSpec((K * Cp, Cp), lambda b, t: (0, 0)) for _ in w_list]
    in_specs += [pl.BlockSpec((1, Cp), lambda b, t: (0, 0)) for _ in b_list]

    # VMEM budget computed from the actual buffers (no hardcoded 32 MiB cap).
    vmem_bytes = (
        2 * Text * Cp * 4                                  # in tile, 2x buf
        + 2 * TILE_T * Cp * 4                              # out tile, 2x buf
        + 2 * n_inner * (K * Cp * Cp * 2 + Cp * 4)         # weights + biases
        + Text * Cp * 4                                    # resid scratch
        + pad_rows * Cp * 4                                # pad scratch
        + Text * K * Cp * 2                                # bf16 im2col temp
        + 4 * Text * Cp * 4)                               # misc f32 temps
    vmem_limit = int(min(max(1.5 * vmem_bytes, 32 * 1024 * 1024),
                         100 * 1024 * 1024))

    out = pl.pallas_call(
        kernel,
        out_shape=jax.ShapeDtypeStruct((B, Tp, Cp), jnp.float32),
        grid_spec=pltpu.PrefetchScalarGridSpec(
            num_scalar_prefetch=0,
            grid=(B, n_t),
            in_specs=in_specs,
            out_specs=pl.BlockSpec((1, TILE_T, Cp), lambda b, t: (b, t, 0)),
            scratch_shapes=[
                pltpu.VMEM((Text, Cp), jnp.float32),       # tile residual (+halo)
                pltpu.VMEM((pad_rows, Cp), jnp.float32),   # zero-framed taps
            ]),
        compiler_params=pltpu.CompilerParams(
            dimension_semantics=("parallel", "parallel"),
            vmem_limit_bytes=vmem_limit),
    )(x_tiles, *w_list, *b_list)

    return jnp.transpose(out[:, :T, :C], (0, 2, 1))


# ----------------------------------------------------------------------------
# Parameter construction (deterministic, in-script); weight_norm folded in
# plain-JAX glue: w = g * v / ||v||  with g initialized to ||v||.
# ----------------------------------------------------------------------------
def init_params(key, C, K, dilations_all):
    params_torch = []   # (w_oik (C,C,K), b (C,)) for the reference conv
    params_pallas = []  # (w_kcc (K,Cin,Cout), b (C,)) for the kernel wrapper
    for dils in dilations_all:
        inner_t, inner_p = [], []
        for _d in dils:
            key, k1, k2 = jax.random.split(key, 3)
            v = 0.01 * jax.random.normal(k1, (C, C, K), jnp.float32)
            norm = jnp.sqrt(jnp.sum(v * v, axis=(1, 2), keepdims=True))
            g = norm[:, 0, 0]                       # weight_norm init: g=||v||
            w = g[:, None, None] * v / norm         # effective conv weight
            b = 0.01 * jax.random.normal(k2, (C,), jnp.float32)
            inner_t.append((w, b))
            inner_p.append((jnp.transpose(w, (2, 1, 0)), b))
        params_torch.append(inner_t)
        params_pallas.append(inner_p)
    return params_torch, params_pallas


# ----------------------------------------------------------------------------
# Pure-JAX reference (PyTorch padding='same' semantics; bf16 conv operands
# with f32 accumulation to mirror the kernel's MXU precision).
# ----------------------------------------------------------------------------
def ref_conv1d_same(x_nct, w_oik, b, dilation):
    K = w_oik.shape[-1]
    total = dilation * (K - 1)
    left = total // 2
    y = lax.conv_general_dilated(
        x_nct.astype(jnp.bfloat16), w_oik.astype(jnp.bfloat16),
        window_strides=(1,), padding=[(left, total - left)],
        rhs_dilation=(dilation,), dimension_numbers=('NCH', 'OIH', 'NCH'),
        preferred_element_type=jnp.float32)
    return y + b[None, :, None]


def ref_resblock(x_nct, params_torch, dilations_all, slope):
    x = x_nct
    for outer_idx, dils in enumerate(dilations_all):
        h = x
        for inner_idx, d in enumerate(dils):
            w, b = params_torch[outer_idx][inner_idx]
            h = jnp.where(h > 0, h, slope * h)
            h = ref_conv1d_same(h, w, b, d)
        x = x + h
    return x


# ----------------------------------------------------------------------------
if __name__ == "__main__":
    # Small synthetic config: kernels_resblocks[block_id]=3,
    # dilations_resblocks[block_id]=[[1,1],[3,1]], relu_slope=0.1.
    # T=40 with tile_t=16 -> 3 time tiles (T not a tile multiple), exercising
    # interior halos, both true sequence boundaries and the tail-padding mask.
    B, C, T = 2, 8, 40
    K = 3
    dilations_all = [[1, 1], [3, 1]]
    slope = 0.1

    key = jax.random.PRNGKey(0)
    key, kx = jax.random.split(key)
    x = jax.random.normal(kx, (B, C, T), jnp.float32)   # NCT, like PyTorch

    params_torch, params_pallas = init_params(key, C, K, dilations_all)

    out = resblock_forward(x, params_pallas, K, dilations_all, slope, tile_t=16)
    out = jax.block_until_ready(out)

    ref = jax.block_until_ready(ref_resblock(x, params_torch, dilations_all, slope))
    np.testing.assert_allclose(np.asarray(out), np.asarray(ref),
                               rtol=2e-3, atol=2e-3)

    print("KERNEL_OK")
</pallas_src>

<mosaic_0001>
module attributes {stable_mosaic.version = 11 : i64} {
  func.func @kernel(%arg0: i32, %arg1: i32, %arg2: memref<1x1x32x128xf32, #tpu.memory_space<vmem>>, %arg3: memref<384x128xbf16, #tpu.memory_space<vmem>>, %arg4: memref<384x128xbf16, #tpu.memory_space<vmem>>, %arg5: memref<384x128xbf16, #tpu.memory_space<vmem>>, %arg6: memref<384x128xbf16, #tpu.memory_space<vmem>>, %arg7: memref<1x128xf32, #tpu.memory_space<vmem>>, %arg8: memref<1x128xf32, #tpu.memory_space<vmem>>, %arg9: memref<1x128xf32, #tpu.memory_space<vmem>>, %arg10: memref<1x128xf32, #tpu.memory_space<vmem>>, %arg11: memref<1x16x128xf32, #tpu.memory_space<vmem>>, %arg12: memref<32x128xf32, #tpu.memory_space<vmem>>, %arg13: memref<48x128xf32, #tpu.memory_space<vmem>>) attributes {dimension_semantics = [#tpu.dimension_semantics<parallel>, #tpu.dimension_semantics<parallel>], iteration_bounds = array<i64: 2, 3>, scalar_prefetch = 0 : i64, scratch_operands = 2 : i64, tpu.core_type = #tpu.core_type<tc>, window_params = [{transform_indices = @transform_0, window_bounds = array<i64: 1, 1, 32, 128>}, {pipeline_mode = #tpu.pipeline_mode<synchronous>, transform_indices = @transform_1, window_bounds = array<i64: 384, 128>}, {pipeline_mode = #tpu.pipeline_mode<synchronous>, transform_indices = @transform_2, window_bounds = array<i64: 384, 128>}, {pipeline_mode = #tpu.pipeline_mode<synchronous>, transform_indices = @transform_3, window_bounds = array<i64: 384, 128>}, {pipeline_mode = #tpu.pipeline_mode<synchronous>, transform_indices = @transform_4, window_bounds = array<i64: 384, 128>}, {pipeline_mode = #tpu.pipeline_mode<synchronous>, transform_indices = @transform_5, window_bounds = array<i64: 1, 128>}, {pipeline_mode = #tpu.pipeline_mode<synchronous>, transform_indices = @transform_6, window_bounds = array<i64: 1, 128>}, {pipeline_mode = #tpu.pipeline_mode<synchronous>, transform_indices = @transform_7, window_bounds = array<i64: 1, 128>}, {pipeline_mode = #tpu.pipeline_mode<synchronous>, transform_indices = @transform_8, window_bounds = array<i64: 1, 128>}, {transform_indices = @transform_9, window_bounds = array<i64: 1, 16, 128>}]} {
    %cst = arith.constant 0.000000e+00 : f32
    %0 = vector.broadcast %cst : f32 to vector<8x128xf32>
    %c0 = arith.constant 0 : index
    %c0_0 = arith.constant 0 : index
    %1 = vector.load %arg13[%c0, %c0_0] : memref<48x128xf32, #tpu.memory_space<vmem>>, vector<8x128xf32>
    tpu.vector_store %arg13[%c0, %c0_0], %0 {strides = array<i32>} : memref<48x128xf32, #tpu.memory_space<vmem>>, vector<8x128xf32>,
    %cst_1 = arith.constant 0.000000e+00 : f32
    %2 = vector.broadcast %cst_1 : f32 to vector<8x128xf32>
    %c40 = arith.constant 40 : index
    %c0_2 = arith.constant 0 : index
    %3 = vector.load %arg13[%c40, %c0_2] : memref<48x128xf32, #tpu.memory_space<vmem>>, vector<8x128xf32>
    tpu.vector_store %arg13[%c40, %c0_2], %2 {strides = array<i32>} : memref<48x128xf32, #tpu.memory_space<vmem>>, vector<8x128xf32>,
    %4 = tpu.iota {dimensions = array<i32: 0>} : vector<32x1xi32>
    %c16_i32 = arith.constant 16 : i32
    %5 = arith.muli %arg1, %c16_i32 : i32
    %c8_i32 = arith.constant 8 : i32
    %6 = arith.subi %5, %c8_i32 : i32
    %7 = vector.broadcast %6 : i32 to vector<32x1xi32>
    %8 = arith.addi %4, %7 : vector<32x1xi32>
    %c0_i32 = arith.constant 0 : i32
    %9 = vector.broadcast %c0_i32 : i32 to vector<32x1xi32>
    %10 = arith.cmpi sge, %8, %9 : vector<32x1xi32>
    %c40_i32 = arith.constant 40 : i32
    %11 = vector.broadcast %c40_i32 : i32 to vector<32x1xi32>
    %12 = arith.cmpi slt, %8, %11 : vector<32x1xi32>
    %13 = arith.andi %10, %12 : vector<32x1xi1>
    %c0_3 = arith.constant 0 : index
    %c0_4 = arith.constant 0 : index
    %c0_5 = arith.constant 0 : index
    %c0_6 = arith.constant 0 : index
    %14 = vector.load %arg2[%c0_3, %c0_4, %c0_5, %c0_6] : memref<1x1x32x128xf32, #tpu.memory_space<vmem>>, vector<1x1x32x128xf32>
    %15 = vector.shape_cast %14 : vector<1x1x32x128xf32> to vector<32x128xf32>
    %cst_7 = arith.constant 0.000000e+00 : f32
    %16 = vector.broadcast %cst_7 : f32 to vector<32x128xf32>
    %17 = arith.cmpf ogt, %15, %16 : vector<32x128xf32>
    %cst_8 = arith.constant 1.000000e-01 : f32
    %18 = vector.broadcast %cst_8 : f32 to vector<32x128xf32>
    %19 = arith.mulf %18, %15 : vector<32x128xf32>
    %20 = arith.select %17, %15, %19 : vector<32x128xi1>, vector<32x128xf32>
    %cst_9 = arith.constant 0.000000e+00 : f32
    %21 = vector.shape_cast %13 : vector<32x1xi1> to vector<32x1xi1>
    %22 = vector.broadcast %21 : vector<32x1xi1> to vector<32x128xi1>
    %23 = vector.broadcast %cst_9 : f32 to vector<32x128xf32>
    %24 = arith.select %22, %20, %23 : vector<32x128xi1>, vector<32x128xf32>
    %c8 = arith.constant 8 : index
    %c0_10 = arith.constant 0 : index
    %25 = vector.load %arg13[%c8, %c0_10] : memref<48x128xf32, #tpu.memory_space<vmem>>, vector<32x128xf32>
    tpu.vector_store %arg13[%c8, %c0_10], %24 {strides = array<i32>} : memref<48x128xf32, #tpu.memory_space<vmem>>, vector<32x128xf32>,
    %c7 = arith.constant 7 : index
    %c0_11 = arith.constant 0 : index
    %26 = vector.load %arg13[%c7, %c0_11] : memref<48x128xf32, #tpu.memory_space<vmem>>, vector<32x128xf32>
    %27 = arith.truncf %26 : vector<32x128xf32> to vector<32x128xbf16>
    %c8_12 = arith.constant 8 : index
    %c0_13 = arith.constant 0 : index
    %28 = vector.load %arg13[%c8_12, %c0_13] : memref<48x128xf32, #tpu.memory_space<vmem>>, vector<32x128xf32>
    %29 = arith.truncf %28 : vector<32x128xf32> to vector<32x128xbf16>
    %c9 = arith.constant 9 : index
    %c0_14 = arith.constant 0 : index
    %30 = vector.load %arg13[%c9, %c0_14] : memref<48x128xf32, #tpu.memory_space<vmem>>, vector<32x128xf32>
    %31 = arith.truncf %30 : vector<32x128xf32> to vector<32x128xbf16>
    %32 = tpu.concatenate %27, %29, %31 in 1 : vector<32x128xbf16>, vector<32x128xbf16>, vector<32x128xbf16> -> vector<32x384xbf16>
    %c0_15 = arith.constant 0 : index
    %c0_16 = arith.constant 0 : index
    %33 = vector.load %arg3[%c0_15, %c0_16] : memref<384x128xbf16, #tpu.memory_space<vmem>>, vector<384x128xbf16>
    %cst_17 = arith.constant dense<0.000000e+00> : vector<32x128xf32>
    %34 = tpu.matmul %32, %33, %cst_17 {dimension_numbers = #tpu.dot_dimension_numbers<[1], [0], [0], [1], [0, 0, 1, 1], [], []>} : vector<32x384xbf16>, vector<384x128xbf16>, vector<32x128xf32> -> vector<32x128xf32>
    %c0_18 = arith.constant 0 : index
    %c0_19 = arith.constant 0 : index
    %35 = vector.load %arg7[%c0_18, %c0_19] : memref<1x128xf32, #tpu.memory_space<vmem>>, vector<1x128xf32>
    %36 = vector.broadcast %35 : vector<1x128xf32> to vector<32x128xf32>
    %37 = arith.addf %34, %36 : vector<32x128xf32>
    %cst_20 = arith.constant 0.000000e+00 : f32
    %38 = vector.broadcast %cst_20 : f32 to vector<32x128xf32>
    %39 = arith.cmpf ogt, %37, %38 : vector<32x128xf32>
    %cst_21 = arith.constant 1.000000e-01 : f32
    %40 = vector.broadcast %cst_21 : f32 to vector<32x128xf32>
    %41 = arith.mulf %40, %37 : vector<32x128xf32>
    %42 = arith.select %39, %37, %41 : vector<32x128xi1>, vector<32x128xf32>
    %cst_22 = arith.constant 0.000000e+00 : f32
    %43 = vector.shape_cast %13 : vector<32x1xi1> to vector<32x1xi1>
    %44 = vector.broadcast %43 : vector<32x1xi1> to vector<32x128xi1>
    %45 = vector.broadcast %cst_22 : f32 to vector<32x128xf32>
    %46 = arith.select %44, %42, %45 : vector<32x128xi1>, vector<32x128xf32>
    %c8_23 = arith.constant 8 : index
    %c0_24 = arith.constant 0 : index
    %47 = vector.load %arg13[%c8_23, %c0_24] : memref<48x128xf32, #tpu.memory_space<vmem>>, vector<32x128xf32>
    tpu.vector_store %arg13[%c8_23, %c0_24], %46 {strides = array<i32>} : memref<48x128xf32, #tpu.memory_space<vmem>>, vector<32x128xf32>,
    %c7_25 = arith.constant 7 : index
    %c0_26 = arith.constant 0 : index
    %48 = vector.load %arg13[%c7_25, %c0_26] : memref<48x128xf32, #tpu.memory_space<vmem>>, vector<32x128xf32>
    %49 = arith.truncf %48 : vector<32x128xf32> to vector<32x128xbf16>
    %c8_27 = arith.constant 8 : index
    %c0_28 = arith.constant 0 : index
    %50 = vector.load %arg13[%c8_27, %c0_28] : memref<48x128xf32, #tpu.memory_space<vmem>>, vector<32x128xf32>
    %51 = arith.truncf %50 : vector<32x128xf32> to vector<32x128xbf16>
    %c9_29 = arith.constant 9 : index
    %c0_30 = arith.constant 0 : index
    %52 = vector.load %arg13[%c9_29, %c0_30] : memref<48x128xf32, #tpu.memory_space<vmem>>, vector<32x128xf32>
    %53 = arith.truncf %52 : vector<32x128xf32> to vector<32x128xbf16>
    %54 = tpu.concatenate %49, %51, %53 in 1 : vector<32x128xbf16>, vector<32x128xbf16>, vector<32x128xbf16> -> vector<32x384xbf16>
    %c0_31 = arith.constant 0 : index
    %c0_32 = arith.constant 0 : index
    %55 = vector.load %arg4[%c0_31, %c0_32] : memref<384x128xbf16, #tpu.memory_space<vmem>>, vector<384x128xbf16>
    %cst_33 = arith.constant dense<0.000000e+00> : vector<32x128xf32>
    %56 = tpu.matmul %54, %55, %cst_33 {dimension_numbers = #tpu.dot_dimension_numbers<[1], [0], [0], [1], [0, 0, 1, 1], [], []>} : vector<32x384xbf16>, vector<384x128xbf16>, vector<32x128xf32> -> vector<32x128xf32>
    %c0_34 = arith.constant 0 : index
    %c0_35 = arith.constant 0 : index
    %57 = vector.load %arg8[%c0_34, %c0_35] : memref<1x128xf32, #tpu.memory_space<vmem>>, vector<1x128xf32>
    %58 = vector.broadcast %57 : vector<1x128xf32> to vector<32x128xf32>
    %59 = arith.addf %56, %58 : vector<32x128xf32>
    %c0_36 = arith.constant 0 : index
    %c0_37 = arith.constant 0 : index
    %c0_38 = arith.constant 0 : index
    %c0_39 = arith.constant 0 : index
    %60 = vector.load %arg2[%c0_36, %c0_37, %c0_38, %c0_39] : memref<1x1x32x128xf32, #tpu.memory_space<vmem>>, vector<1x1x32x128xf32>
    %61 = vector.shape_cast %60 : vector<1x1x32x128xf32> to vector<32x128xf32>
    %62 = arith.addf %61, %59 : vector<32x128xf32>
    %c0_40 = arith.constant 0 : index
    %c0_41 = arith.constant 0 : index
    %63 = vector.load %arg12[%c0_40, %c0_41] : memref<32x128xf32, #tpu.memory_space<vmem>>, vector<32x128xf32>
    tpu.vector_store %arg12[%c0_40, %c0_41], %62 {strides = array<i32>} : memref<32x128xf32, #tpu.memory_space<vmem>>, vector<32x128xf32>,
    %c0_42 = arith.constant 0 : index
    %c0_43 = arith.constant 0 : index
    %64 = vector.load %arg12[%c0_42, %c0_43] : memref<32x128xf32, #tpu.memory_space<vmem>>, vector<32x128xf32>
    %cst_44 = arith.constant 0.000000e+00 : f32
    %65 = vector.broadcast %cst_44 : f32 to vector<32x128xf32>
    %66 = arith.cmpf ogt, %64, %65 : vector<32x128xf32>
    %cst_45 = arith.constant 1.000000e-01 : f32
    %67 = vector.broadcast %cst_45 : f32 to vector<32x128xf32>
    %68 = arith.mulf %67, %64 : vector<32x128xf32>
    %69 = arith.select %66, %64, %68 : vector<32x128xi1>, vector<32x128xf32>
    %cst_46 = arith.constant 0.000000e+00 : f32
    %70 = vector.shape_cast %13 : vector<32x1xi1> to vector<32x1xi1>
    %71 = vector.broadcast %70 : vector<32x1xi1> to vector<32x128xi1>
    %72 = vector.broadcast %cst_46 : f32 to vector<32x128xf32>
    %73 = arith.select %71, %69, %72 : vector<32x128xi1>, vector<32x128xf32>
    %c8_47 = arith.constant 8 : index
    %c0_48 = arith.constant 0 : index
    %74 = vector.load %arg13[%c8_47, %c0_48] : memref<48x128xf32, #tpu.memory_space<vmem>>, vector<32x128xf32>
    tpu.vector_store %arg13[%c8_47, %c0_48], %73 {strides = array<i32>} : memref<48x128xf32, #tpu.memory_space<vmem>>, vector<32x128xf32>,
    %c5 = arith.constant 5 : index
    %c0_49 = arith.constant 0 : index
    %75 = vector.load %arg13[%c5, %c0_49] : memref<48x128xf32, #tpu.memory_space<vmem>>, vector<32x128xf32>
    %76 = arith.truncf %75 : vector<32x128xf32> to vector<32x128xbf16>
    %c8_50 = arith.constant 8 : index
    %c0_51 = arith.constant 0 : index
    %77 = vector.load %arg13[%c8_50, %c0_51] : memref<48x128xf32, #tpu.memory_space<vmem>>, vector<32x128xf32>
    %78 = arith.truncf %77 : vector<32x128xf32> to vector<32x128xbf16>
    %c11 = arith.constant 11 : index
    %c0_52 = arith.constant 0 : index
    %79 = vector.load %arg13[%c11, %c0_52] : memref<48x128xf32, #tpu.memory_space<vmem>>, vector<32x128xf32>
    %80 = arith.truncf %79 : vector<32x128xf32> to vector<32x128xbf16>
    %81 = tpu.concatenate %76, %78, %80 in 1 : vector<32x128xbf16>, vector<32x128xbf16>, vector<32x128xbf16> -> vector<32x384xbf16>
    %c0_53 = arith.constant 0 : index
    %c0_54 = arith.constant 0 : index
    %82 = vector.load %arg5[%c0_53, %c0_54] : memref<384x128xbf16, #tpu.memory_space<vmem>>, vector<384x128xbf16>
    %cst_55 = arith.constant dense<0.000000e+00> : vector<32x128xf32>
    %83 = tpu.matmul %81, %82, %cst_55 {dimension_numbers = #tpu.dot_dimension_numbers<[1], [0], [0], [1], [0, 0, 1, 1], [], []>} : vector<32x384xbf16>, vector<384x128xbf16>, vector<32x128xf32> -> vector<32x128xf32>
    %c0_56 = arith.constant 0 : index
    %c0_57 = arith.constant 0 : index
    %84 = vector.load %arg9[%c0_56, %c0_57] : memref<1x128xf32, #tpu.memory_space<vmem>>, vector<1x128xf32>
    %85 = vector.broadcast %84 : vector<1x128xf32> to vector<32x128xf32>
    %86 = arith.addf %83, %85 : vector<32x128xf32>
    %cst_58 = arith.constant 0.000000e+00 : f32
    %87 = vector.broadcast %cst_58 : f32 to vector<32x128xf32>
    %88 = arith.cmpf ogt, %86, %87 : vector<32x128xf32>
    %cst_59 = arith.constant 1.000000e-01 : f32
    %89 = vector.broadcast %cst_59 : f32 to vector<32x128xf32>
    %90 = arith.mulf %89, %86 : vector<32x128xf32>
    %91 = arith.select %88, %86, %90 : vector<32x128xi1>, vector<32x128xf32>
    %cst_60 = arith.constant 0.000000e+00 : f32
    %92 = vector.shape_cast %13 : vector<32x1xi1> to vector<32x1xi1>
    %93 = vector.broadcast %92 : vector<32x1xi1> to vector<32x128xi1>
    %94 = vector.broadcast %cst_60 : f32 to vector<32x128xf32>
    %95 = arith.select %93, %91, %94 : vector<32x128xi1>, vector<32x128xf32>
    %c8_61 = arith.constant 8 : index
    %c0_62 = arith.constant 0 : index
    %96 = vector.load %arg13[%c8_61, %c0_62] : memref<48x128xf32, #tpu.memory_space<vmem>>, vector<32x128xf32>
    tpu.vector_store %arg13[%c8_61, %c0_62], %95 {strides = array<i32>} : memref<48x128xf32, #tpu.memory_space<vmem>>, vector<32x128xf32>,
    %c7_63 = arith.constant 7 : index
    %c0_64 = arith.constant 0 : index
    %97 = vector.load %arg13[%c7_63, %c0_64] : memref<48x128xf32, #tpu.memory_space<vmem>>, vector<32x128xf32>
    %98 = arith.truncf %97 : vector<32x128xf32> to vector<32x128xbf16>
    %c8_65 = arith.constant 8 : index
    %c0_66 = arith.constant 0 : index
    %99 = vector.load %arg13[%c8_65, %c0_66] : memref<48x128xf32, #tpu.memory_space<vmem>>, vector<32x128xf32>
    %100 = arith.truncf %99 : vector<32x128xf32> to vector<32x128xbf16>
    %c9_67 = arith.constant 9 : index
    %c0_68 = arith.constant 0 : index
    %101 = vector.load %arg13[%c9_67, %c0_68] : memref<48x128xf32, #tpu.memory_space<vmem>>, vector<32x128xf32>
    %102 = arith.truncf %101 : vector<32x128xf32> to vector<32x128xbf16>
    %103 = tpu.concatenate %98, %100, %102 in 1 : vector<32x128xbf16>, vector<32x128xbf16>, vector<32x128xbf16> -> vector<32x384xbf16>
    %c0_69 = arith.constant 0 : index
    %c0_70 = arith.constant 0 : index
    %104 = vector.load %arg6[%c0_69, %c0_70] : memref<384x128xbf16, #tpu.memory_space<vmem>>, vector<384x128xbf16>
    %cst_71 = arith.constant dense<0.000000e+00> : vector<32x128xf32>
    %105 = tpu.matmul %103, %104, %cst_71 {dimension_numbers = #tpu.dot_dimension_numbers<[1], [0], [0], [1], [0, 0, 1, 1], [], []>} : vector<32x384xbf16>, vector<384x128xbf16>, vector<32x128xf32> -> vector<32x128xf32>
    %c0_72 = arith.constant 0 : index
    %c0_73 = arith.constant 0 : index
    %106 = vector.load %arg10[%c0_72, %c0_73] : memref<1x128xf32, #tpu.memory_space<vmem>>, vector<1x128xf32>
    %107 = vector.broadcast %106 : vector<1x128xf32> to vector<32x128xf32>
    %108 = arith.addf %105, %107 : vector<32x128xf32>
    %c0_74 = arith.constant 0 : index
    %c0_75 = arith.constant 0 : index
    %109 = vector.load %arg12[%c0_74, %c0_75] : memref<32x128xf32, #tpu.memory_space<vmem>>, vector<32x128xf32>
    %110 = arith.addf %109, %108 : vector<32x128xf32>
    %c0_76 = arith.constant 0 : index
    %c0_77 = arith.constant 0 : index
    %111 = vector.load %arg12[%c0_76, %c0_77] : memref<32x128xf32, #tpu.memory_space<vmem>>, vector<32x128xf32>
    tpu.vector_store %arg12[%c0_76, %c0_77], %110 {strides = array<i32>} : memref<32x128xf32, #tpu.memory_space<vmem>>, vector<32x128xf32>,
    %c8_78 = arith.constant 8 : index
    %c0_79 = arith.constant 0 : index
    %112 = vector.load %arg12[%c8_78, %c0_79] : memref<32x128xf32, #tpu.memory_space<vmem>>, vector<16x128xf32>
    %c0_80 = arith.constant 0 : index
    %c0_81 = arith.constant 0 : index
    %c0_82 = arith.constant 0 : index
    %113 = vector.load %arg11[%c0_80, %c0_81, %c0_82] : memref<1x16x128xf32, #tpu.memory_space<vmem>>, vector<1x16x128xf32>
    %114 = vector.shape_cast %113 : vector<1x16x128xf32> to vector<16x128xf32>
    %115 = vector.shape_cast %112 : vector<16x128xf32> to vector<1x16x128xf32>
    tpu.vector_store %arg11[%c0_80, %c0_81, %c0_82], %115 {strides = array<i32>} : memref<1x16x128xf32, #tpu.memory_space<vmem>>, vector<1x16x128xf32>,
    return
  }
  func.func @transform_0(%arg0: i32, %arg1: i32) -> (i32, i32, i32, i32) {
    %c0_i32 = arith.constant 0 : i32
    %c0_i32_0 = arith.constant 0 : i32
    %c0_i32_1 = arith.constant 0 : i32
    return %arg0, %arg1, %c0_i32, %c0_i32_0 : i32, i32, i32, i32
  }
  func.func @transform_1(%arg0: i32, %arg1: i32) -> (i32, i32) {
    %c0_i32 = arith.constant 0 : i32
    %c0_i32_0 = arith.constant 0 : i32
    %c0_i32_1 = arith.constant 0 : i32
    return %c0_i32, %c0_i32_0 : i32, i32
  }
  func.func @transform_2(%arg0: i32, %arg1: i32) -> (i32, i32) {
    %c0_i32 = arith.constant 0 : i32
    %c0_i32_0 = arith.constant 0 : i32
    %c0_i32_1 = arith.constant 0 : i32
    return %c0_i32, %c0_i32_0 : i32, i32
  }
  func.func @transform_3(%arg0: i32, %arg1: i32) -> (i32, i32) {
    %c0_i32 = arith.constant 0 : i32
    %c0_i32_0 = arith.constant 0 : i32
    %c0_i32_1 = arith.constant 0 : i32
    return %c0_i32, %c0_i32_0 : i32, i32
  }
  func.func @transform_4(%arg0: i32, %arg1: i32) -> (i32, i32) {
    %c0_i32 = arith.constant 0 : i32
    %c0_i32_0 = arith.constant 0 : i32
    %c0_i32_1 = arith.constant 0 : i32
    return %c0_i32, %c0_i32_0 : i32, i32
  }
  func.func @transform_5(%arg0: i32, %arg1: i32) -> (i32, i32) {
    %c0_i32 = arith.constant 0 : i32
    %c0_i32_0 = arith.constant 0 : i32
    %c0_i32_1 = arith.constant 0 : i32
    return %c0_i32, %c0_i32_0 : i32, i32
  }
  func.func @transform_6(%arg0: i32, %arg1: i32) -> (i32, i32) {
    %c0_i32 = arith.constant 0 : i32
    %c0_i32_0 = arith.constant 0 : i32
    %c0_i32_1 = arith.constant 0 : i32
    return %c0_i32, %c0_i32_0 : i32, i32
  }
  func.func @transform_7(%arg0: i32, %arg1: i32) -> (i32, i32) {
    %c0_i32 = arith.constant 0 : i32
    %c0_i32_0 = arith.constant 0 : i32
    %c0_i32_1 = arith.constant 0 : i32
    return %c0_i32, %c0_i32_0 : i32, i32
  }
  func.func @transform_8(%arg0: i32, %arg1: i32) -> (i32, i32) {
    %c0_i32 = arith.constant 0 : i32
    %c0_i32_0 = arith.constant 0 : i32
    %c0_i32_1 = arith.constant 0 : i32
    return %c0_i32, %c0_i32_0 : i32, i32
  }
  func.func @transform_9(%arg0: i32, %arg1: i32) -> (i32, i32, i32) {
    %c0_i32 = arith.constant 0 : i32
    %c0_i32_0 = arith.constant 0 : i32
    return %arg0, %arg1, %c0_i32 : i32, i32, i32
  }
}

</mosaic_0001>

<bundles_post_ra>
// kernel: tpu_custom_call.1
= control target key start
LH: loop header
LB: loop body
LE: loop exit
PB: predicated region body
PF: predicated region fallthrough
CT: control target
= control target key end

     0   :  { %s3277_s0 = inlined_call_operand.hbm [shape: f32[2,3,32,128], index: 0, kind: input, shape index: {}]   ;;  %s3278_s1 = inlined_call_operand.hbm [shape: bf16[384,128], index: 1, kind: input, shape index: {}]   ;;  %s3279_s2 = inlined_call_operand.hbm [shape: bf16[384,128], index: 2, kind: input, shape index: {}]   ;;  %s3280_s3 = inlined_call_operand.hbm [shape: bf16[384,128], index: 3, kind: input, shape index: {}]   ;;  %s3281_s4 = inlined_call_operand.hbm [shape: bf16[384,128], index: 4, kind: input, shape index: {}]   ;;  %s3282_s5 = inlined_call_operand.vmem [shape: f32[1,128], index: 5, kind: input, shape index: {}]   ;;  %s3283_s6 = inlined_call_operand.vmem [shape: f32[1,128], index: 6, kind: input, shape index: {}]   ;;  %s3284_s7 = inlined_call_operand.vmem [shape: f32[1,128], index: 7, kind: input, shape index: {}]   ;;  %s3285_s8 = inlined_call_operand.vmem [shape: f32[1,128], index: 8, kind: input, shape index: {}]   ;;  %s3286_s9 = inlined_call_operand.hbm [shape: f32[2,48,128], index: 9, kind: output, shape index: {}]  }
   0x1   :  { %3295 = sst [smem:[#allocation23_spill]] %s3278_s1 }
   0x2   :  { %3296 = sst [smem:[#allocation24_spill]] %s3279_s2 }
   0x3   :  { %3297 = sst [smem:[#allocation25_spill]] %s3280_s3 }
   0x4   :  { %3298 = sst [smem:[#allocation26_spill]] %s3281_s4 }
   0x5   :  { %3299 = sst [smem:[#allocation27_spill]] %s3285_s8 }
   0x6   :  { %3300 = sst [smem:[#allocation28_spill]] %s3286_s9 }
   0x7   :  { %14 = vsyncpa [#allocation5], 0 }
   0x8   :  { %16 = vsyncpa [#allocation5 + $0x1], 0 }
   0x9   :  { %17 = vsyncpa [#allocation8], 0 }
   0xa   :  { %18 = vsyncpa [#allocation11], 0 }
   0xb   :  { %19 = vsyncpa [#allocation6], 0 }
   0xc   :  { %21 = vsyncpa [#allocation6 + $0x1], 0  ;;  %s2889_s30 = smov 0   ;;  %s2891_s10 = smov 0  }
   0xd   :  { %s2893_s11 = smov 0   ;;  %s2895_s12 = smov 0  }
   0xe   :  { %s2897_s13 = smov 0   ;;  %s2899_s14 = smov 0  }
   0xf   :  { %s2901_s15 = smov 0   ;;  %s2903_s16 = smov 0  }
  0x10 LB: > { %3301 = sst [smem:[#allocation18_spill]] %s2796_s30  ;;  %s1983_s17 = sadd.s32 4294967295, %s2824_s16   ;;  %s2824_s16 = sphi %s2903_s16, %s27_s16   ;;  %s2820_s15 = sphi %s2901_s15, %s3345_s15   ;;  %s2816_s14 = sphi %s2899_s14, %s3344_s14   ;;  %s2812_s13 = sphi %s2897_s13, %s3343_s13   ;;  %s2808_s12 = sphi %s2895_s12, %s3342_s12   ;;  %s2804_s11 = sphi %s2893_s11, %s3341_s11   ;;  %s2800_s10 = sphi %s2891_s10, %s3340_s10   ;;  %s2796_s30 = sphi %s2889_s30, %s3339_s30  }
  0x11   : > { %3302 = sst [smem:[#allocation19_spill]] %s2824_s16  ;;  %s1984_s18 = sadd.s32 4294967294, %s2824_s16  }
  0x12   : > { %p61_p0 = scmp.ne.s32.totalorder %s2800_s10, %s2796_s30  ;;  %p2933_p1 = scmp.eq.s32.totalorder %s1983_s17, 0 }
  0x13   : > { %p2937_p2 = scmp.eq.s32.totalorder %s1983_s17, 5  ;;  %p261_p3 = scmp.eq.s32.totalorder %s1984_s18, 5 }
  0x14   : > { %p2943_p4 = por %p2933_p1, %p61_p0  ;;  %p1985_p5 = scmp.ge.s32.totalorder %s2824_s16, 1 }
  0x15   : > { %p2948_p6 = por %p261_p3, %p61_p0  ;;  %p268_p7 = scmp.lt.s32.totalorder %s2824_s16, 7 }
  0x16   : > { %s2826_s24 = smov [#allocation7]   ;;  %s2827_s27 = smov [#allocation10]  }
  0x17   : > { %s3306_s22 = scalar_select %p2948_p6, 1, 0 }
  0x18   : > { %p2953_p8 = pnand %p1985_p5, %p268_p7  ;;  %s280_s25 = sshll.u32 %s2826_s24, 4  ;;  %s281_s25 = int_to_ptr.vmem [resolvable:$true] %s280_s25 }
  0x19   : > { %3307 = sst [smem:[#allocation20_spill]] %s3306_s22  ;;  %s306_s28 = sshll.u32 %s2827_s27, 4  ;;  %s307_s28 = int_to_ptr.vmem [resolvable:$true] %s306_s28 }
  0x1a   : > { %p2362_p9 = pneg %p2953_p8  ;;  %s2828_s29 = smov [#allocation9]  }
  0x1b   : > { %s293_s17 = sshll.u32 %s2828_s29, 4  ;;  %s2599_s18 = scalar_lea.vmem %s281_s25, 3072  ;;  %s294_s17 = int_to_ptr.vmem [resolvable:$true] %s293_s17 }
  0x1c   : > { %p2961_p10 = pnand %p2362_p9, %p2933_p1  ;;  %p2600_p12 = scmp.ne.s32.totalorder %s281_s25, %s2599_s18 }
  0x1d   : > { %p2607_p3 = scmp.lt.s32.totalorder %s281_s25, %s281_s25  ;;  %p2608_p5 = scmp.lt.s32.totalorder %s2599_s18, %s2599_s18 }
  0x1e   : > { %p2590_p11 = pneg %p2961_p10 }
  0x1f   : > { %p2609_p7 = por %p2608_p5, %p2607_p3 }
  0x20   : > { %p2602_p13 = pnand %p2600_p12, %p2590_p11 }
  0x22   : > { %p2603_p0 = pneg %p2602_p13 }
  0x24   : > { %p2610_p9 = pnand %p2609_p7, %p2603_p0 }
  0x26   : > { %2613 = shalt.err (!%p2610_p9)
}
  0x27   : > { %s2829_s24 = smov 64   ;;  %s2830_s27 = smov 4  }
  0x28   : > { %s3310_s1 = sld [smem:[#allocation23_spill]]  ;;  %s2625_s30 = scalar_lea.vmem %s307_s28, 3072 }
  0x29   : > { %p2626_p12 = scmp.ne.s32.totalorder %s307_s28, %s2625_s30  ;;  %p2633_p0 = scmp.lt.s32.totalorder %s307_s28, %s307_s28 }
  0x2a   : > { %p2634_p5 = scmp.lt.s32.totalorder %s2625_s30, %s2625_s30 }
  0x2b   : > { %p2628_p13 = pnand %p2626_p12, %p2590_p11 }
  0x2c   : > { %p2635_p7 = por %p2634_p5, %p2633_p0 }
  0x2d   : > { %p2629_p3 = pneg %p2628_p13 }
  0x2e   : > { %2365 = dma.hbm_to_vmem [thread:$0]  (!%p2961_p10), %s3310_s1, 3072, %s281_s25, [#allocation8], %s2829_s24, %s2829_s24, %s2830_s27  }
  0x2f   : > { %p2636_p9 = pnand %p2635_p7, %p2629_p3 }
  0x31   : > { %2639 = shalt.err (!%p2636_p9)
}
  0x32   : > { %s3311_s3 = sld [smem:[#allocation25_spill]]  ;;  %s2651_s22 = scalar_lea.vmem %s294_s17, 3072 }
  0x33   : > { %p2652_p6 = scmp.ne.s32.totalorder %s294_s17, %s2651_s22  ;;  %p2659_p0 = scmp.lt.s32.totalorder %s294_s17, %s294_s17 }
  0x34   : > { %p2660_p3 = scmp.lt.s32.totalorder %s2651_s22, %s2651_s22 }
  0x35   : > { %p2654_p12 = pnand %p2652_p6, %p2590_p11 }
  0x36   : > { %p2661_p5 = por %p2660_p3, %p2659_p0 }
  0x37   : > { %p2655_p13 = pneg %p2654_p12 }
  0x38   : > { %2371 = dma.hbm_to_vmem [thread:$0]  (!%p2961_p10), %s3311_s3, 3072, %s307_s28, [#allocation11], %s2829_s24, %s2829_s24, %s2830_s27  }
  0x39   : > { %p2662_p7 = pnand %p2661_p5, %p2655_p13 }
  0x3b   : > { %2665 = shalt.err (!%p2662_p7)
}
  0x3c   : > { %s3312_s2 = sld [smem:[#allocation24_spill]]  ;;  %s2831_s25 = smov [#allocation12]  }
  0x3d   : > { %s319_s28 = sshll.u32 %s2831_s25, 4  ;;  %s320_s28 = int_to_ptr.vmem [resolvable:$true] %s319_s28 }
  0x3e   : > { %s2677_s29 = scalar_lea.vmem %s320_s28, 3072  ;;  %p2685_p13 = scmp.lt.s32.totalorder %s320_s28, %s320_s28 }
  0x3f   : > { %p2678_p6 = scmp.ne.s32.totalorder %s320_s28, %s2677_s29  ;;  %p2686_p0 = scmp.lt.s32.totalorder %s2677_s29, %s2677_s29 }
  0x41   : > { %p2680_p9 = pnand %p2678_p6, %p2590_p11  ;;  %p2687_p3 = por %p2686_p0, %p2685_p13 }
  0x42   : > { %2368 = dma.hbm_to_vmem [thread:$0]  (!%p2961_p10), %s3312_s2, 3072, %s294_s17, [#allocation8], %s2829_s24, %s2829_s24, %s2830_s27  }
  0x43   : > { %p2681_p12 = pneg %p2680_p9 }
  0x45   : > { %p2688_p5 = pnand %p2687_p3, %p2681_p12 }
  0x47   : > { %2691 = shalt.err (!%p2688_p5)
}
  0x48   : > { %s3313_s4 = sld [smem:[#allocation26_spill]]  ;;  %s36_s22 = sadd.s32 1, %s2816_s14 }
  0x49   : > { %s39_s26 = sadd.s32 1, %s2820_s15  ;;  %p37_p11 = scmp.ge.s32.totalorder %s36_s22, 3 }
  0x4a   : > { %s48_s9 = sadd.s32 1, %s2804_s11  ;;  %p55_p7 = scmp.ne.s32.totalorder %s2804_s11, %s2800_s10 }
  0x4b   : > { %p56_p6 = scmp.eq.s32.totalorder %s2824_s16, 0  ;;  %s3347_s22 = smov (%p37_p11, %s36_s22), 0 }
  0x4c   : > { %3314 = sst [smem:[#allocation21_spill]] %s3347_s22  ;;  %s3349_s26 = smov (!%p37_p11, %s39_s26), %s2820_s15 }
  0x4d   : > { %s44_s30 = ssub.s32 %s2816_s14, %s3347_s22  ;;  %p3022_p9 = por %p56_p6, %p55_p7 }
  0x4e   : > { %2374 = dma.hbm_to_vmem [thread:$0]  (!%p2961_p10), %s3313_s4, 3072, %s320_s28, [#allocation11], %s2829_s24, %s2829_s24, %s2830_s27  }
  0x4f   : > { %p41_p10 = scmp.ge.s32.totalorder %s3349_s26, 2  ;;  %p3028_p12 = por %p2937_p2, %p55_p7 }
  0x50   : > { %p2387_p13 = scmp.lt.s32.totalorder %s2824_s16, 6  ;;  %s345_s27 = sand.u32 1, %s2804_s11  }
  0x51   : > { %s3316_s24 = scalar_select %p3028_p12, 1, 0 }
  0x52   : > { %s3351_s26 = smov (%p41_p10, %s3349_s26), 0  ;;  %s1991_s28 = sshll.u32 %s345_s27, 5 }
  0x53   : > { %3317 = sst [smem:[#allocation22_spill]] %s3316_s24  ;;  %s43_s29 = ssub.s32 %s2820_s15, %s3351_s26 }
  0x54   : > { %s45_s17 = sor.u32 %s44_s30, %s43_s29  ;;  %s1992_s18 = sshll.u32 %s2816_s14, 2 }
  0x55   : > { %p46_p0 = scmp.eq.s32.totalorder %s45_s17, 0  ;;  %s2340_s1 = smul.u32 12, %s2820_s15 }
  0x56   : > { %s349_s2 = scalar_lea.vmem [#allocation4], %s1991_s28  ;;  %p3042_p3 = pnand %p2387_p13, %p3022_p9 }
  0x57   : > { %s358_s3 = sshll.u32 %s349_s2, 4  ;;  %s355_s22 = sadd.s32 %s2340_s1, %s1992_s18  ;;  %s359_s3 = int_to_ptr.vmem [resolvable:$true] %s358_s3 }
  0x58   : > { %s3047_s4 = scalar_select %p46_p0, %s2804_s11, %s48_s9  }
  0x59   : > { %s1993_s16 = sshll.u32 %s355_s22, 7  ;;  %s346_s29 = scalar_lea.sflag [#allocation5], %s345_s27 }
  0x5a   : > { %s357_s30 = scalar_lea.hbm %s3277_s0, %s1993_s16  ;;  %p2694_p2 = pneg %p3042_p3 }
  0x5b   : > { %s2705_s28 = scalar_lea.vmem %s359_s3, 512  ;;  %s2832_s2 = smov [#allocation4]  }
  0x5c   : > { %p2706_p5 = scmp.ne.s32.totalorder %s359_s3, %s2705_s28  ;;  %s2710_s25 = sshll.u32 %s2832_s2, 4  ;;  %s2711_s25 = int_to_ptr.vmem [resolvable:$false] %s2710_s25 }
  0x5d   : > { %s2712_s17 = scalar_lea.vmem %s2711_s25, 1024  ;;  %p2713_p6 = scmp.lt.s32.totalorder %s359_s3, %s2711_s25 }
  0x5e   : > { %p2708_p11 = pnand %p2706_p5, %p2694_p2  ;;  %p2714_p9 = scmp.lt.s32.totalorder %s2712_s17, %s2705_s28 }
  0x60   : > { %p2709_p7 = pneg %p2708_p11  ;;  %p2715_p10 = por %p2714_p9, %p2713_p6 }
  0x62   : > { %p2716_p13 = pnand %p2715_p10, %p2709_p7 }
  0x64   : > { %2719 = shalt.err (!%p2716_p13)
}
  0x65   : > { %s2833_s1 = smov 128   ;;  %s2834_s8 = smov 8  }
  0x66   : > { %2378 = dma.hbm_to_vmem [thread:$0]  (!%p3042_p3), %s357_s30, 512, %s359_s3, %s346_s29, %s2833_s1, %s2833_s1, %s2834_s8  }
  0x67   : > { %370 = sbr.rel (%p2953_p8) target bundleno = 1036 (0x40c), region = 56  ;;  %s3059_s16 = sand.u32 (!%p2953_p8), 1, %s2800_s10  }
  0x68   : > { %s1995_s22 = sshll.u32 (!%p2953_p8), %s3059_s16, 5  ;;  %s373_s9 = scalar_lea.sflag (!%p2953_p8), [#allocation5], %s3059_s16 }
  0x69   : > { %s3063_s24 = scalar_lea.vmem (!%p2953_p8), [#allocation4], %s1995_s22 }
  0x6c   : > { %2779 = dma.done.wait (%p2943_p4), %s373_s9, 512  }
  0x6d   : > { %2781 = vsyncadd (%p2943_p4), %s373_s9, 4294966784 }
  0x6e   : > { %2783 = dma.done.wait (%p2933_p1), [#allocation8], 6144  }
  0x6f   : > { %2785 = vsyncadd (%p2933_p1), [#allocation8], 4294961152 }
  0x70   : > { %2787 = dma.done.wait (%p2933_p1), [#allocation11], 6144  }
  0x71   : > { %2789 = vsyncadd (%p2933_p1), [#allocation11], 4294961152  ;;  %v2835_v0 = vmov 0.0   ;;  %v2468_v1 = vld [vmem:[#allocation7 + $0x78] sm:$0xff]   ;;  %v2471_v4 = vld [vmem:[#allocation7 + $0x70] sm:$0xff]   ;;  %v431_v7 = vlaneseq  ;;  %s2001_s3 = sshll.u32 %s2808_s12, 4 }
  0x72   : > { %429 = vst [vmem:[#allocation3] sm:$0xff] %v2835_v0  ;;  %430 = vst [vmem:[#allocation3 + $0x28] sm:$0xff] %v2835_v0  ;;  %v2469_v2 = vld [vmem:[#allocation7 + $0xb8] sm:$0xff]   ;;  %2108 = vmatprep.subr.bf16.mxu0 %v2468_v1  ;;  %v2472_v5 = vld [vmem:[#allocation7 + $0xb0] sm:$0xff]   ;;  %s2002_s19 = sadd.s32 4294967288, %s2001_s3  ;;  %s2000_s29 = sshll.u32 %s3059_s16, 4 }
  0x73   : > { %v2470_v3 = vld [vmem:[#allocation7 + $0x38] sm:$0xff]   ;;  %2260 = vmatprep.subr.bf16.mxu1 %v2469_v2  ;;  %v2473_v6 = vld [vmem:[#allocation7 + $0x30] sm:$0xff]   ;;  %v2474_v8 = vld [vmem:[#allocation7 + $0x68] sm:$0xff]   ;;  %v432_v12 = vshrl.u32 %v431_v7, 7  ;;  %v438_v16 = vstv %s2002_s19  ;;  %s2341_s28 = smul.u32 6, %s2812_s13  ;;  %s2104_s2 = sshll.u32 %s2808_s12, 1 }
  0x74   : > { %2109 = vmatpush3.bf16.msra.mxu0 %v2470_v3  ;;  %2261 = vmatpush3.bf16.msra.mxu1 %v2469_v2  ;;  %v2475_v9 = vld [vmem:[#allocation7 + $0xa8] sm:$0xff]   ;;  %v2477_v11 = vld [vmem:[#allocation7 + $0x60] sm:$0xff]   ;;  %v2480_v15 = vld [vmem:[#allocation7 + $0x58] sm:$0xff]   ;;  %s3331_s1 = sld [smem:[#allocation27_spill]]  ;;  %s426_s9 = scalar_lea.vmem [#allocation13], %s2000_s29 }
  0x75   : > { %2110 = vmatprep.subr.bf16.mxu0 %v2471_v4  ;;  %2262 = vmatprep.subr.bf16.mxu1 %v2472_v5  ;;  %v2476_v10 = vld [vmem:[#allocation7 + $0x28] sm:$0xff]   ;;  %v2478_v13 = vld [vmem:[#allocation7 + $0xa0] sm:$0xff]   ;;  %v2481_v17 = vld [vmem:[#allocation7 + $0x98] sm:$0xff]   ;;  %v433_v18 = vadd.s32 8, %v432_v12  ;;  %v434_v20 = vadd.s32 16, %v432_v12  ;;  %v439_v21 = vadd.s32 %v438_v16, %v432_v12  ;;  %v435_v23 = vadd.s32 24, %v432_v12  ;;  %s1852_s8 = sadd.s32 %s2341_s28, %s2104_s2 }
  0x76   : > { %v2479_v14 = vld [vmem:[#allocation7 + $0x20] sm:$0xff]   ;;  %v2482_v19 = vld [vmem:[#allocation7 + $0x18] sm:$0xff]   ;;  %v2483_v22 = vld [vmem:[#allocation7 + $0x50] sm:$0xff]   ;;  %s1855_s13 = sshll.u32 %s426_s9, 4  ;;  %s2105_s12 = sshll.u32 %s1852_s8, 7  ;;  %s3218_s13 = int_to_ptr.vmem [resolvable:$true] %s1855_s13 }
  0x77   : > { %v2484_v24 = vld [vmem:[#allocation7 + $0x90] sm:$0xff]   ;;  %v440_v25 = vadd.s32 %v438_v16, %v433_v18  ;;  %vm443_vm0 = vcmp.ge.s32.totalorder %v439_v21, 0  ;;  %v2486_v27 = vld [vmem:[#allocation7 + $0x48] sm:$0xff]   ;;  %v441_v28 = vadd.s32 %v438_v16, %v434_v20  ;;  %vm447_vm1 = vcmp.lt.s32.totalorder %v439_v21, 40  ;;  %v2489_v32 = vld [vmem:[#allocation7 + $0x40] sm:$0xff]   ;;  %s3333_s19 = sld [smem:[#allocation28_spill]] }
  0x78   : > { %2111 = vmatpush3.bf16.msra.mxu0 %v2473_v6  ;;  %2263 = vmatpush3.bf16.msra.mxu1 %v2472_v5  ;;  %v2485_v26 = vld [vmem:[#allocation7 + $0x10] sm:$0xff]   ;;  %v442_v29 = vadd.s32 %v438_v16, %v435_v23  ;;  %v2487_v30 = vld [vmem:[#allocation7 + $0x88] sm:$0xff]   ;;  %v2490_v33 = vld [vmem:[#allocation7 + $0x80] sm:$0xff]   ;;  %s1840_s23 = scalar_lea.sflag [#allocation6], %s3059_s16  ;;  %s2720_s27 = scalar_lea.vmem %s3218_s13, 256 }
  0x79   : > { %2112 = vmatprep.subr.bf16.mxu0 %v2474_v8  ;;  %2264 = vmatprep.subr.bf16.mxu1 %v2475_v9  ;;  %vm444_vm2 = vcmp.ge.s32.totalorder %v440_v25, 0  ;;  %v2488_v31 = vld [vmem:[#allocation7 + $0x8] sm:$0xff]   ;;  %vm448_vm3 = vcmp.lt.s32.totalorder %v440_v25, 40  ;;  %vm3079_vm4 = vmand %vm443_vm0, %vm447_vm1  ;;  %v3084_v35 = vld [vmem:[%s3063_s24] sm:$0xff]  ;;  %vm445_vm5 = vcmp.ge.s32.totalorder %v441_v28, 0  ;;  %vm449_vm6 = vcmp.lt.s32.totalorder %v441_v28, 40  ;;  %p2721_p1 = scmp.ne.s32.totalorder %s3218_s13, %s2720_s27 }
  0x7a   : > { %v3087_v36 = vld [vmem:[%s3063_s24 + $0x8] sm:$0xff]  ;;  %vm446_vm7 = vcmp.ge.s32.totalorder %v442_v29, 0  ;;  %vm450_vm8 = vcmp.lt.s32.totalorder %v442_v29, 40  ;;  %vm3090_vm9 = vmand %vm444_vm2, %vm448_vm3  ;;  %vm459_vm10 = vcmp.gt.f32.partialorder %v3084_v35, 0.0  ;;  %v463_v38 = vmul.f32 0.1, %v3084_v35 }
  0x7b   : > { %vm460_vm11 = vcmp.gt.f32.partialorder %v3087_v36, 0.0  ;;  %v464_v39 = vmul.f32 0.1, %v3087_v36  ;;  %v3099_v40 = vld [vmem:[%s3063_s24 + $0x10] sm:$0xff]  ;;  %v3102_v41 = vld [vmem:[%s3063_s24 + $0x18] sm:$0xff]  ;;  %v2491_v42 = vld [vmem:[#allocation7] sm:$0xff]   ;;  %p2722_p4 = pnand %p2721_p1, %p3028_p12 }
  0x7c   : > { %2113 = vmatpush3.bf16.msra.mxu0 %v2476_v10  ;;  %2265 = vmatpush3.bf16.msra.mxu1 %v2475_v9  ;;  %v467_v43 = vsel %vm459_vm10, %v3084_v35, %v463_v38  ;;  %vm3108_vm12 = vmand %vm445_vm5, %vm449_vm6  ;;  %vm461_vm13 = vcmp.gt.f32.partialorder %v3099_v40, 0.0  ;;  %v465_v46 = vmul.f32 0.1, %v3099_v40  ;;  %vm462_vm15 = vcmp.gt.f32.partialorder %v3102_v41, 0.0  ;;  %v2492_v51 = vld [vmem:[#allocation9 + $0x78] sm:$0xff]   ;;  %v2494_v9 = vld [vmem:[#allocation9 + $0x70] sm:$0xff]  }
  0x7d   : > { %2114 = vmatprep.subr.bf16.mxu0 %v2477_v11  ;;  %2266 = vmatprep.subr.bf16.mxu1 %v2478_v13  ;;  %v468_v44 = vsel %vm460_vm11, %v3087_v36, %v464_v39  ;;  %v479_v47 = vsel %vm3079_vm4, %v467_v43, 0.0  ;;  %vm3120_vm14 = vmand %vm446_vm7, %vm450_vm8  ;;  %v466_v50 = vmul.f32 0.1, %v3102_v41  ;;  %v2493_v58 = vld [vmem:[#allocation9 + $0x38] sm:$0xff]   ;;  %v2495_v10 = vld [vmem:[#allocation9 + $0x30] sm:$0xff]   ;;  %s3224_s21 = scalar_lea.hbm %s3333_s19, %s2105_s12  ;;  %p2723_p8 = pneg %p2722_p4 }
  0x7e   : > { %v480_v48 = vsel %vm3090_vm9, %v468_v44, 0.0  ;;  %483 = vst [vmem:[#allocation3 + $0x8] sm:$0xff] %v479_v47  ;;  %v469_v52 = vsel %vm461_vm13, %v3099_v40, %v465_v46  ;;  %vm3134_vm0 = vmpackc.low %vm3090_vm9, %vm3079_vm4  ;;  %v2565_v56 = vpack.c.bf16 %v468_v44, %v467_v43  ;;  %v2496_v11 = vld [vmem:[#allocation9 + $0xb8] sm:$0xff]   ;;  %v2497_v12 = vld [vmem:[#allocation9 + $0x68] sm:$0xff]   ;;  %s2836_s18 = smov [#allocation13]  }
  0x7f   : > { %484 = vst [vmem:[#allocation3 + $0x10] sm:$0xff] %v480_v48  ;;  %v481_v53 = vsel %vm3108_vm12, %v469_v52, 0.0  ;;  %v470_v54 = vsel %vm462_vm15, %v3102_v41, %v466_v50  ;;  %vm3146_vm1 = vmpackc.low %vm3120_vm14, %vm3108_vm12  ;;  %v2501_v16 = vld [vmem:[#allocation9 + $0x20] sm:$0xff]   ;;  %v2503_v18 = vld [vmem:[#allocation9 + $0x58] sm:$0xff]   ;;  %s2724_s20 = sshll.u32 %s2836_s18, 4  ;;  %s2725_s20 = int_to_ptr.vmem [resolvable:$false] %s2724_s20 }
  0x80   : > { %2115 = vmatpush3.bf16.msra.mxu0 %v2479_v14  ;;  %2267 = vmatpush3.bf16.msra.mxu1 %v2478_v13  ;;  %485 = vst [vmem:[#allocation3 + $0x18] sm:$0xff] %v481_v53  ;;  %v482_v57 = vsel %vm3120_vm14, %v470_v54, 0.0  ;;  %v2568_v7 = vpack.c.bf16 %v470_v54, %v469_v52  ;;  %v2498_v13 = vld [vmem:[#allocation9 + $0x28] sm:$0xff]   ;;  %v2499_v14 = vld [vmem:[#allocation9 + $0xb0] sm:$0xff]   ;;  %v2505_v20 = vld [vmem:[#allocation9 + $0xa0] sm:$0xff]   ;;  %s2726_s30 = scalar_lea.vmem %s2725_s20, 512  ;;  %p2727_p0 = scmp.lt.s32.totalorder %s3218_s13, %s2725_s20 }
  0x81   : > { %2116 = vmatprep.subr.bf16.mxu0 %v2480_v15  ;;  %2268 = vmatprep.subr.bf16.mxu1 %v2481_v17  ;;  %486 = vst [vmem:[#allocation3 + $0x20] sm:$0xff] %v482_v57  ;;  %v2500_v15 = vld [vmem:[#allocation9 + $0x60] sm:$0xff]   ;;  %v2506_v21 = vld [vmem:[#allocation9 + $0x50] sm:$0xff]   ;;  %v2508_v23 = vld [vmem:[#allocation9 + $0x98] sm:$0xff]   ;;  %p2728_p3 = scmp.lt.s32.totalorder %s2726_s30, %s2720_s27 }
  0x82   : > { %2566 = vmatprep.mubr.msk.bf16.mxu0 %vm3134_vm0, %v2565_v56  ;;  %v2510_v25 = vld [vmem:[#allocation9 + $0x8] sm:$0xff]   ;;  %v2513_v28 = vld [vmem:[#allocation9] sm:$0xff]  }
  0x83   : > { %v2514_v29 = vld [vmem:[#allocation9 + $0x88] sm:$0xff]   ;;  %p2729_p2 = por %p2728_p3, %p2727_p0 }
  0x84   : > { %2117 = vmatpush3.bf16.msra.mxu0 %v2482_v19  ;;  %2269 = vmatpush3.bf16.msra.mxu1 %v2481_v17  ;;  %v2502_v17 = vld [vmem:[#allocation9 + $0xa8] sm:$0xff]   ;;  %v2504_v19 = vld [vmem:[#allocation9 + $0x18] sm:$0xff]  }
  0x85   : > { %2118 = vmatprep.subr.bf16.mxu0 %v2483_v22  ;;  %2270 = vmatprep.subr.bf16.mxu1 %v2484_v24  ;;  %v487_v60 = vld [vmem:[#allocation3 + $0x7] sm:$0xff]  ;;  %p2730_p5 = pnand %p2729_p2, %p2723_p8 }
  0x86   : > { %v499_v59 = vld [vmem:[#allocation3 + $0x9] sm:$0xff]  ;;  %v2507_v22 = vld [vmem:[#allocation9 + $0x10] sm:$0xff]  }
  0x87   : > { %v488_v61 = vld [vmem:[#allocation3 + $0xf] sm:$0xff]  ;;  %v489_v0 = vld [vmem:[#allocation3 + $0x17] sm:$0xff] }
  0x88   : > { %2119 = vmatpush3.bf16.msra.mxu0 %v2485_v26  ;;  %2271 = vmatpush3.bf16.msra.mxu1 %v2484_v24  ;;  %v491_v62 = vpack.c.bf16 %v488_v61, %v487_v60  ;;  %v500_v63 = vld [vmem:[#allocation3 + $0x11] sm:$0xff]  ;;  %v501_v2 = vld [vmem:[#allocation3 + $0x19] sm:$0xff]  ;;  %v502_v3 = vld [vmem:[#allocation3 + $0x21] sm:$0xff] }
  0x89   : > { %2120 = vmatprep.subr.bf16.mxu0 %v2486_v27  ;;  %2272 = vmatprep.subr.bf16.mxu1 %v2487_v30  ;;  %v503_v1 = vpack.c.bf16 %v500_v63, %v499_v59  ;;  %v490_v4 = vld [vmem:[#allocation3 + $0x1f] sm:$0xff]  ;;  %v504_v5 = vpack.c.bf16 %v502_v3, %v501_v2  ;;  %v2512_v27 = vld [vmem:[#allocation9 + $0x40] sm:$0xff]  }
  0x8a   : > { %v492_v8 = vpack.c.bf16 %v490_v4, %v489_v0  ;;  %v2509_v24 = vld [vmem:[#allocation9 + $0x48] sm:$0xff]   ;;  %v2511_v26 = vld [vmem:[#allocation9 + $0x90] sm:$0xff]  }
  0x8b   : > { %2276 = vmatprep.mubr.bf16.mxu1 %v503_v1 }
  0x8c   : > { %2121 = vmatpush3.bf16.msra.mxu0 %v2488_v31  ;;  %2273 = vmatpush3.bf16.msra.mxu1 %v2487_v30  ;;  %v2515_v30 = vld [vmem:[#allocation9 + $0x80] sm:$0xff]  }
  0x8d   : > { %2122 = vmatprep.subr.bf16.mxu0 %v2489_v32  ;;  %2274 = vmatprep.subr.bf16.mxu1 %v2490_v33 }
  0x90   : > { %2123 = vmatpush3.bf16.msra.mxu0 %v2491_v42  ;;  %2275 = vmatpush3.bf16.msra.mxu1 %v2490_v33  ;;  %v2003_v33 = vld [vmem:[%s3282_s5] ss:$0 sm:$0xff] }
  0x91   : > { %2146 = vmatprep.subr.bf16.mxu0 %v2492_v51  ;;  %2280 = vmatprep.subr.bf16.mxu1 %v2496_v11 }
  0x93   : > { %737 = vmatmul.mubr.bf16.vlgmr.msra.gmra.mxu0 %v491_v62  ;;  %2277 = vmatmul.mubr.bf16.vlgmr.msra.gmra.mxu1 %v504_v5 }
  0x94   : > { %2569 = vmatprep.mubr.msk.bf16.mxu0 %vm3146_vm1, %v2568_v7  ;;  %2147 = vmatpush3.bf16.msra.mxu0 %v2493_v58 }
  0x95   : > { %2148 = vmatprep.subr.bf16.mxu0 %v2494_v9  ;;  %2281 = vmatpush3.bf16.msra.mxu1 %v2496_v11 }
  0x96   : > { %2282 = vmatprep.subr.bf16.mxu1 %v2499_v14 }
  0x98   : > { %2149 = vmatpush3.bf16.msra.mxu0 %v2495_v10 }
  0x99   : > { %2150 = vmatprep.subr.bf16.mxu0 %v2497_v12  ;;  %2283 = vmatpush3.bf16.msra.mxu1 %v2499_v14 }
  0x9a   : > { %2284 = vmatprep.subr.bf16.mxu1 %v2502_v17 }
  0x9b   : > { %745 = vmatmul.mubr.bf16.gmra.mxu0 %v492_v8 }
  0x9c   : > { %2151 = vmatpush3.bf16.msra.mxu0 %v2498_v13 }
  0x9d   : > { %2152 = vmatprep.subr.bf16.mxu0 %v2500_v15  ;;  %2285 = vmatpush3.bf16.msra.mxu1 %v2502_v17 }
  0x9e   : > { %2286 = vmatprep.subr.bf16.mxu1 %v2505_v20 }
  0xa0   : > { %2153 = vmatpush3.bf16.msra.mxu0 %v2501_v16 }
  0xa1   : > { %2154 = vmatprep.subr.bf16.mxu0 %v2503_v18  ;;  %2287 = vmatpush3.bf16.msra.mxu1 %v2505_v20 }
  0xa2   : > { %2288 = vmatprep.subr.bf16.mxu1 %v2508_v23 }
  0xa4   : > { %2155 = vmatpush3.bf16.msra.mxu0 %v2504_v19 }
  0xa5   : > { %2156 = vmatprep.subr.bf16.mxu0 %v2506_v21  ;;  %2289 = vmatpush3.bf16.msra.mxu1 %v2508_v23 }
  0xa6   : > { %2290 = vmatprep.subr.bf16.mxu1 %v2511_v26 }
  0xa8   : > { %2157 = vmatpush3.bf16.msra.mxu0 %v2507_v22 }
  0xa9   : > { %2158 = vmatprep.subr.bf16.mxu0 %v2509_v24  ;;  %2291 = vmatpush3.bf16.msra.mxu1 %v2511_v26 }
  0xaa   : > { %2292 = vmatprep.subr.bf16.mxu1 %v2514_v29 }
  0xac   : > { %2159 = vmatpush3.bf16.msra.mxu0 %v2510_v25 }
  0xad   : > { %2160 = vmatprep.subr.bf16.mxu0 %v2512_v27  ;;  %2293 = vmatpush3.bf16.msra.mxu1 %v2514_v29  ;;  %v2517_v29 = vld [vmem:[#allocation10 + $0x38] sm:$0xff]  }
  0xae   : > { %2294 = vmatprep.subr.bf16.mxu1 %v2515_v30 }
  0xb0   : > { %2161 = vmatpush3.bf16.msra.mxu0 %v2513_v28  ;;  %v2516_v28 = vld [vmem:[#allocation10 + $0x78] sm:$0xff]  }
  0xb1   : > { %2295 = vmatpush3.bf16.msra.mxu1 %v2515_v30  ;;  %2184 = vmatprep.subr.bf16.mxu0 %v2516_v28  ;;  %v2518_v30 = vld [vmem:[#allocation10 + $0x70] sm:$0xff]  }
 0x153   : > { %v2124_v31 = vpop.f32.mrf.mxu0  ;;  %v2278_v38 = vpop.f32.mrf.mxu1 }
 0x155   : > { %v2125_v32 = vpop.f32.mrf.mxu0  ;;  %v787_v44 = vpop.f32.mrf.mxu1 }
 0x156   : > { %v2126_v39 = vadd.f32 %v2125_v32, %v2124_v31  ;;  %v2519_v31 = vld [vmem:[#allocation10 + $0xb8] sm:$0xff]   ;;  %v2520_v32 = vld [vmem:[#allocation10 + $0x30] sm:$0xff]  }
 0x157   : > { %v2127_v42 = vpop.f32.mrf.mxu0  ;;  %v2279_v48 = vpop.f32.mrf.mxu1  ;;  %2300 = vmatprep.subr.bf16.mxu1 %v2519_v31 }
 0x158   : > { %v739_v43 = vadd.f32 %v2126_v39, %v2003_v33  ;;  %v2523_v39 = vld [vmem:[#allocation10 + $0x28] sm:$0xff]  }
 0x159   : > { %v2128_v46 = vpop.f32.mrf.mxu0  ;;  %v790_v54 = vpop.f32.mrf.mxu1 }
 0x15a   : > { %v788_v47 = vadd.f32 %v787_v44, %v739_v43  ;;  %v2129_v50 = vadd.f32 %v2128_v46, %v2127_v42  ;;  %v2524_v42 = vld [vmem:[#allocation10 + $0x60] sm:$0xff]   ;;  %v2525_v43 = vld [vmem:[#allocation10 + $0xa8] sm:$0xff]   ;;  %v2527_v46 = vld [vmem:[#allocation10 + $0x58] sm:$0xff]  }
 0x15b   : > { %v2130_v51 = vpop.f32.mrf.mxu0  ;;  %v2526_v44 = vld [vmem:[#allocation10 + $0x20] sm:$0xff]  }
 0x15c   : > { %vm802_vm2 = vcmp.gt.f32.partialorder %v788_v47, 0.0  ;;  %v806_v52 = vmul.f32 0.1, %v788_v47  ;;  %v742_v53 = vadd.f32 %v2129_v50, %v2003_v33  ;;  %v2530_v50 = vld [vmem:[#allocation10 + $0x50] sm:$0xff]  }
 0x15d   : > { %v2131_v56 = vpop.f32.mrf.mxu0 }
 0x15e   : > { %v810_v57 = vsel %vm802_vm2, %v788_v47, %v806_v52  ;;  %v791_v58 = vadd.f32 %v790_v54, %v742_v53  ;;  %v2132_v59 = vadd.f32 %v2131_v56, %v2130_v51  ;;  %v2528_v47 = vld [vmem:[#allocation10 + $0xa0] sm:$0xff]   ;;  %v2531_v51 = vld [vmem:[#allocation10 + $0x98] sm:$0xff]   ;;  %v2532_v52 = vld [vmem:[#allocation10 + $0x10] sm:$0xff]  }
 0x15f   : > { %v814_v60 = vsel %vm3079_vm4, %v810_v57, 0.0  ;;  %v2133_v61 = vpop.f32.mrf.mxu0  ;;  %v2533_v53 = vld [vmem:[#allocation10 + $0x48] sm:$0xff]   ;;  %v2534_v54 = vld [vmem:[#allocation10 + $0x90] sm:$0xff]  }
 0x160   : > { %818 = vst [vmem:[#allocation3 + $0x8] sm:$0xff] %v814_v60  ;;  %vm803_vm3 = vcmp.gt.f32.partialorder %v791_v58, 0.0  ;;  %v807_v62 = vmul.f32 0.1, %v791_v58  ;;  %v747_v63 = vadd.f32 %v2132_v59, %v2003_v33  ;;  %v2535_v56 = vld [vmem:[#allocation10 + $0x8] sm:$0xff]   ;;  %v2538_v59 = vld [vmem:[#allocation10] sm:$0xff]  }
 0x161   : > { %v2134_v0 = vpop.f32.mrf.mxu0  ;;  %v2539_v60 = vld [vmem:[#allocation10 + $0x80] sm:$0xff]  }
 0x162   : > { %v811_v1 = vsel %vm803_vm3, %v791_v58, %v807_v62  ;;  %v796_v2 = vadd.f32 %v2278_v38, %v747_v63  ;;  %v2135_v3 = vadd.f32 %v2134_v0, %v2133_v61  ;;  %v2522_v38 = vld [vmem:[#allocation10 + $0xb0] sm:$0xff]   ;;  %v2537_v58 = vld [vmem:[#allocation10 + $0x88] sm:$0xff]   ;;  %v2540_v61 = vld [vmem:[#allocation12 + $0x78] sm:$0xff]  }
 0x163   : > { %v815_v4 = vsel %vm3090_vm9, %v811_v1, 0.0  ;;  %v2571_v10 = vpack.c.bf16 %v811_v1, %v810_v57  ;;  %v2536_v57 = vld [vmem:[#allocation10 + $0x40] sm:$0xff]  }
 0x164   : > { %819 = vst [vmem:[#allocation3 + $0x10] sm:$0xff] %v815_v4  ;;  %vm804_vm5 = vcmp.gt.f32.partialorder %v796_v2, 0.0  ;;  %v808_v5 = vmul.f32 0.1, %v796_v2  ;;  %v750_v7 = vadd.f32 %v2135_v3, %v2003_v33  ;;  %v2521_v33 = vld [vmem:[#allocation10 + $0x68] sm:$0xff]  }
 0x165   : > { %2572 = vmatprep.mubr.msk.bf16.mxu0 %vm3134_vm0, %v2571_v10  ;;  %v2028_v3 = vld [vmem:[%s3283_s6] ss:$0 sm:$0xff] }
 0x166   : > { %v812_v8 = vsel %vm804_vm5, %v796_v2, %v808_v5  ;;  %v799_v9 = vadd.f32 %v2279_v48, %v750_v7  ;;  %v2529_v48 = vld [vmem:[#allocation10 + $0x18] sm:$0xff]  }
 0x167   : > { %v816_v11 = vsel %vm3108_vm12, %v812_v8, 0.0  ;;  %v822_v15 = vld [vmem:[#allocation3 + $0x7] sm:$0xff] }
 0x168   : > { %820 = vst [vmem:[#allocation3 + $0x18] sm:$0xff] %v816_v11  ;;  %vm805_vm6 = vcmp.gt.f32.partialorder %v799_v9, 0.0  ;;  %v809_v12 = vmul.f32 0.1, %v799_v9 }
 0x16a   : > { %v813_v13 = vsel %vm805_vm6, %v799_v9, %v809_v12 }
 0x16b   : > { %v817_v14 = vsel %vm3120_vm14, %v813_v13, 0.0  ;;  %v823_v16 = vld [vmem:[#allocation3 + $0xf] sm:$0xff]  ;;  %v2574_v20 = vpack.c.bf16 %v813_v13, %v812_v8 }
 0x16c   : > { %821 = vst [vmem:[#allocation3 + $0x20] sm:$0xff] %v817_v14  ;;  %v826_v17 = vpack.c.bf16 %v823_v16, %v822_v15  ;;  %v834_v18 = vld [vmem:[#allocation3 + $0x9] sm:$0xff] }
 0x16e   : > { %1072 = vmatmul.mubr.bf16.vlgmr.msra.gmra.mxu0 %v826_v17 }
 0x16f   : > { %v835_v19 = vld [vmem:[#allocation3 + $0x11] sm:$0xff]  ;;  %2575 = vmatprep.mubr.msk.bf16.mxu0 %vm3146_vm1, %v2574_v20  ;;  %2185 = vmatpush3.bf16.msra.mxu0 %v2517_v29 }
 0x170   : > { %v838_v21 = vpack.c.bf16 %v835_v19, %v834_v18  ;;  %v824_v22 = vld [vmem:[#allocation3 + $0x17] sm:$0xff]  ;;  %2186 = vmatprep.subr.bf16.mxu0 %v2518_v30 }
 0x172   : > { %2296 = vmatprep.mubr.bf16.mxu1 %v838_v21 }
 0x173   : > { %v836_v23 = vld [vmem:[#allocation3 + $0x19] sm:$0xff]  ;;  %v837_v24 = vld [vmem:[#allocation3 + $0x21] sm:$0xff]  ;;  %2187 = vmatpush3.bf16.msra.mxu0 %v2520_v32 }
 0x174   : > { %v825_v25 = vld [vmem:[#allocation3 + $0x1f] sm:$0xff]  ;;  %v839_v26 = vpack.c.bf16 %v837_v24, %v836_v23  ;;  %2188 = vmatprep.subr.bf16.mxu0 %v2521_v33 }
 0x175   : > { %v827_v27 = vpack.c.bf16 %v825_v25, %v824_v22 }
 0x176   : > { %2297 = vmatmul.mubr.bf16.vlgmr.msra.gmra.mxu1 %v839_v26 }
 0x177   : > { %1080 = vmatmul.mubr.bf16.gmra.mxu0 %v827_v27  ;;  %2301 = vmatpush3.bf16.msra.mxu1 %v2519_v31 }
 0x178   : > { %2302 = vmatprep.subr.bf16.mxu1 %v2522_v38  ;;  %2189 = vmatpush3.bf16.msra.mxu0 %v2523_v39 }
 0x179   : > { %2190 = vmatprep.subr.bf16.mxu0 %v2524_v42 }
 0x17b   : > { %2303 = vmatpush3.bf16.msra.mxu1 %v2522_v38 }
 0x17c   : > { %2304 = vmatprep.subr.bf16.mxu1 %v2525_v43  ;;  %2191 = vmatpush3.bf16.msra.mxu0 %v2526_v44 }
 0x17d   : > { %2192 = vmatprep.subr.bf16.mxu0 %v2527_v46  ;;  %v2541_v46 = vld [vmem:[#allocation12 + $0x38] sm:$0xff]  }
 0x17f   : > { %2305 = vmatpush3.bf16.msra.mxu1 %v2525_v43 }
 0x180   : > { %2306 = vmatprep.subr.bf16.mxu1 %v2528_v47  ;;  %2193 = vmatpush3.bf16.msra.mxu0 %v2529_v48 }
 0x181   : > { %2194 = vmatprep.subr.bf16.mxu0 %v2530_v50 }
 0x183   : > { %2307 = vmatpush3.bf16.msra.mxu1 %v2528_v47 }
 0x184   : > { %2308 = vmatprep.subr.bf16.mxu1 %v2531_v51  ;;  %2195 = vmatpush3.bf16.msra.mxu0 %v2532_v52 }
 0x185   : > { %2196 = vmatprep.subr.bf16.mxu0 %v2533_v53 }
 0x187   : > { %2309 = vmatpush3.bf16.msra.mxu1 %v2531_v51 }
 0x188   : > { %2310 = vmatprep.subr.bf16.mxu1 %v2534_v54  ;;  %2197 = vmatpush3.bf16.msra.mxu0 %v2535_v56 }
 0x189   : > { %2198 = vmatprep.subr.bf16.mxu0 %v2536_v57 }
 0x18b   : > { %2311 = vmatpush3.bf16.msra.mxu1 %v2534_v54 }
 0x18c   : > { %2312 = vmatprep.subr.bf16.mxu1 %v2537_v58  ;;  %2199 = vmatpush3.bf16.msra.mxu0 %v2538_v59 }
 0x18d   : > { %2222 = vmatprep.subr.bf16.mxu0 %v2540_v61  ;;  %v2543_v61 = vld [vmem:[#allocation12 + $0x30] sm:$0xff]  }
 0x18f   : > { %2313 = vmatpush3.bf16.msra.mxu1 %v2537_v58 }
 0x190   : > { %2314 = vmatprep.subr.bf16.mxu1 %v2539_v60 }
 0x193   : > { %2315 = vmatpush3.bf16.msra.mxu1 %v2539_v60  ;;  %v2542_v60 = vld [vmem:[#allocation12 + $0x70] sm:$0xff]  }
 0x22e   : > { %v2162_v62 = vpop.f32.mrf.mxu0 }
 0x230   : > { %v2163_v63 = vpop.f32.mrf.mxu0 }
 0x231   : > { %v2164_v1 = vadd.f32 %v2163_v63, %v2162_v62  ;;  %v2544_v62 = vld [vmem:[#allocation12 + $0xb8] sm:$0xff]   ;;  %v2545_v63 = vld [vmem:[#allocation12 + $0x68] sm:$0xff]  }
 0x232   : > { %v2165_v0 = vpop.f32.mrf.mxu0  ;;  %2320 = vmatprep.subr.bf16.mxu1 %v2544_v62 }
 0x233   : > { %v1074_v8 = vadd.f32 %v2164_v1, %v2028_v3  ;;  %v2547_v1 = vld [vmem:[#allocation12 + $0xb0] sm:$0xff]  }
 0x234   : > { %v2166_v2 = vpop.f32.mrf.mxu0 }
 0x235   : > { %v2167_v7 = vadd.f32 %v2166_v2, %v2165_v0  ;;  %v2546_v0 = vld [vmem:[#allocation12 + $0x28] sm:$0xff]   ;;  %v2548_v2 = vld [vmem:[#allocation12 + $0x60] sm:$0xff]  }
 0x236   : > { %v2298_v4 = vpop.f32.mrf.mxu1 }
 0x237   : > { %v2168_v5 = vpop.f32.mrf.mxu0  ;;  %v1077_v17 = vadd.f32 %v2167_v7, %v2028_v3  ;;  %v2552_v7 = vld [vmem:[#allocation12 + $0x18] sm:$0xff]  }
 0x238   : > { %v1122_v9 = vpop.f32.mrf.mxu1 }
 0x239   : > { %v2169_v10 = vpop.f32.mrf.mxu0  ;;  %v1123_v11 = vadd.f32 %v1122_v9, %v1074_v8  ;;  %v2553_v8 = vld [vmem:[#allocation12 + $0xa0] sm:$0xff]   ;;  %v2554_v9 = vld [vmem:[#allocation12 + $0x50] sm:$0xff]  }
 0x23a   : > { %v2170_v12 = vadd.f32 %v2169_v10, %v2168_v5  ;;  %v2299_v13 = vpop.f32.mrf.mxu1  ;;  %v2551_v5 = vld [vmem:[#allocation12 + $0x58] sm:$0xff]   ;;  %v2555_v10 = vld [vmem:[#allocation12 + $0x10] sm:$0xff]  }
 0x23b   : > { %v2171_v14 = vpop.f32.mrf.mxu0  ;;  %v1141_v15 = vadd.f32 %v1123_v11, %v3084_v35  ;;  %v2556_v11 = vld [vmem:[#allocation12 + $0x98] sm:$0xff]  }
 0x23c   : > { %v1082_v16 = vadd.f32 %v2170_v12, %v2028_v3  ;;  %v1125_v18 = vpop.f32.mrf.mxu1  ;;  %v2557_v12 = vld [vmem:[#allocation12 + $0x48] sm:$0xff]  }
 0x23d   : > { %v2172_v19 = vpop.f32.mrf.mxu0  ;;  %vm1153_vm7 = vcmp.gt.f32.partialorder %v1141_v15, 0.0  ;;  %v1157_v20 = vmul.f32 0.1, %v1141_v15  ;;  %v1126_v22 = vadd.f32 %v1125_v18, %v1077_v17  ;;  %v2562_v17 = vld [vmem:[#allocation12 + $0x88] sm:$0xff]   ;;  %v2563_v18 = vld [vmem:[#allocation12 + $0x80] sm:$0xff]  }
 0x23e   : > { %v1131_v21 = vadd.f32 %v2298_v4, %v1082_v16  ;;  %v2173_v23 = vadd.f32 %v2172_v19, %v2171_v14  ;;  %v2550_v4 = vld [vmem:[#allocation12 + $0xa8] sm:$0xff]   ;;  %v2559_v14 = vld [vmem:[#allocation12 + $0x90] sm:$0xff]   ;;  %v2561_v16 = vld [vmem:[#allocation12] sm:$0xff]  }
 0x23f   : > { %v1161_v24 = vsel %vm1153_vm7, %v1141_v15, %v1157_v20  ;;  %v3175_v26 = vadd.f32 %v1126_v22, %v3087_v36  ;;  %v2560_v15 = vld [vmem:[#allocation12 + $0x40] sm:$0xff]  }
 0x240   : > { %v3172_v25 = vadd.f32 %v1131_v21, %v3099_v40  ;;  %v1165_v27 = vsel %vm3079_vm4, %v1161_v24, 0.0  ;;  %v1085_v35 = vadd.f32 %v2173_v23, %v2028_v3  ;;  %v2549_v3 = vld [vmem:[#allocation12 + $0x20] sm:$0xff]   ;;  %v2053_v21 = vld [vmem:[%s3284_s7] ss:$0 sm:$0xff] }
 0x241   : > { %1169 = vst [vmem:[#allocation3 + $0x8] sm:$0xff] %v1165_v27  ;;  %vm1154_vm10 = vcmp.gt.f32.partialorder %v3175_v26, 0.0  ;;  %v1158_v29 = vmul.f32 0.1, %v3175_v26 }
 0x242   : > { %vm1155_vm8 = vcmp.gt.f32.partialorder %v3172_v25, 0.0  ;;  %v1159_v28 = vmul.f32 0.1, %v3172_v25  ;;  %v1134_v30 = vadd.f32 %v2299_v13, %v1085_v35  ;;  %v2558_v13 = vld [vmem:[#allocation12 + $0x8] sm:$0xff]  }
 0x243   : > { %v1162_v31 = vsel %vm1154_vm10, %v3175_v26, %v1158_v29 }
 0x244   : > { %v1163_v40 = vsel %vm1155_vm8, %v3172_v25, %v1159_v28  ;;  %v1166_v32 = vsel %vm3090_vm9, %v1162_v31, 0.0  ;;  %v1144_v33 = vadd.f32 %v1134_v30, %v3102_v41  ;;  %v2577_v39 = vpack.c.bf16 %v1162_v31, %v1161_v24 }
 0x245   : > { %v1167_v36 = vsel %vm3108_vm12, %v1163_v40, 0.0  ;;  %1170 = vst [vmem:[#allocation3 + $0x10] sm:$0xff] %v1166_v32 }
 0x246   : > { %1171 = vst [vmem:[#allocation3 + $0x18] sm:$0xff] %v1167_v36  ;;  %vm1156_vm11 = vcmp.gt.f32.partialorder %v1144_v33, 0.0  ;;  %v1160_v38 = vmul.f32 0.1, %v1144_v33  ;;  %2578 = vmatprep.mubr.msk.bf16.mxu0 %vm3134_vm0, %v2577_v39 }
 0x248   : > { %v1164_v42 = vsel %vm1156_vm11, %v1144_v33, %v1160_v38  ;;  %v1173_v44 = vld [vmem:[#allocation3 + $0x5] sm:$0xff] }
 0x249   : > { %v1168_v43 = vsel %vm3120_vm14, %v1164_v42, 0.0  ;;  %v2580_v52 = vpack.c.bf16 %v1164_v42, %v1163_v40 }
 0x24a   : > { %1172 = vst [vmem:[#allocation3 + $0x20] sm:$0xff] %v1168_v43 }
 0x24c   : > { %v1174_v47 = vld [vmem:[#allocation3 + $0xd] sm:$0xff] }
 0x24d   : > { %v1185_v48 = vld [vmem:[#allocation3 + $0xb] sm:$0xff]  ;;  %v1186_v50 = vld [vmem:[#allocation3 + $0x13] sm:$0xff]  ;;  %v1177_v51 = vpack.c.bf16 %v1174_v47, %v1173_v44 }
 0x24e   : > { %v1189_v41 = vpack.c.bf16 %v1186_v50, %v1185_v48  ;;  %v1175_v58 = vld [vmem:[#allocation3 + $0x15] sm:$0xff] }
 0x24f   : > { %1423 = vmatmul.mubr.bf16.vlgmr.msra.gmra.mxu0 %v1177_v51 }
 0x250   : > { %2316 = vmatprep.mubr.bf16.mxu1 %v1189_v41  ;;  %2581 = vmatprep.mubr.msk.bf16.mxu0 %vm3146_vm1, %v2580_v52 }
 0x251   : > { %2223 = vmatpush3.bf16.msra.mxu0 %v2541_v46  ;;  %v1187_v53 = vld [vmem:[#allocation3 + $0x1b] sm:$0xff]  ;;  %v1188_v54 = vld [vmem:[#allocation3 + $0x23] sm:$0xff] }
 0x252   : > { %v1190_v56 = vpack.c.bf16 %v1188_v54, %v1187_v53  ;;  %v1176_v57 = vld [vmem:[#allocation3 + $0x1d] sm:$0xff]  ;;  %2224 = vmatprep.subr.bf16.mxu0 %v2542_v60 }
 0x253   : > { %v1178_v59 = vpack.c.bf16 %v1176_v57, %v1175_v58 }
 0x254   : > { %2317 = vmatmul.mubr.bf16.vlgmr.msra.gmra.mxu1 %v1190_v56 }
 0x255   : > { %2225 = vmatpush3.bf16.msra.mxu0 %v2543_v61  ;;  %2321 = vmatpush3.bf16.msra.mxu1 %v2544_v62 }
 0x256   : > { %2226 = vmatprep.subr.bf16.mxu0 %v2545_v63  ;;  %2322 = vmatprep.subr.bf16.mxu1 %v2547_v1 }
 0x257   : > { %1431 = vmatmul.mubr.bf16.gmra.mxu0 %v1178_v59 }
 0x259   : > { %2227 = vmatpush3.bf16.msra.mxu0 %v2546_v0  ;;  %2323 = vmatpush3.bf16.msra.mxu1 %v2547_v1 }
 0x25a   : > { %2228 = vmatprep.subr.bf16.mxu0 %v2548_v2  ;;  %2324 = vmatprep.subr.bf16.mxu1 %v2550_v4 }
 0x25d   : > { %2229 = vmatpush3.bf16.msra.mxu0 %v2549_v3  ;;  %2325 = vmatpush3.bf16.msra.mxu1 %v2550_v4 }
 0x25e   : > { %2230 = vmatprep.subr.bf16.mxu0 %v2551_v5  ;;  %2326 = vmatprep.subr.bf16.mxu1 %v2553_v8 }
 0x261   : > { %2231 = vmatpush3.bf16.msra.mxu0 %v2552_v7  ;;  %2327 = vmatpush3.bf16.msra.mxu1 %v2553_v8 }
 0x262   : > { %2232 = vmatprep.subr.bf16.mxu0 %v2554_v9  ;;  %2328 = vmatprep.subr.bf16.mxu1 %v2556_v11 }
 0x265   : > { %2233 = vmatpush3.bf16.msra.mxu0 %v2555_v10  ;;  %2329 = vmatpush3.bf16.msra.mxu1 %v2556_v11 }
 0x266   : > { %2234 = vmatprep.subr.bf16.mxu0 %v2557_v12  ;;  %2330 = vmatprep.subr.bf16.mxu1 %v2559_v14 }
 0x269   : > { %2235 = vmatpush3.bf16.msra.mxu0 %v2558_v13  ;;  %2331 = vmatpush3.bf16.msra.mxu1 %v2559_v14 }
 0x26a   : > { %2236 = vmatprep.subr.bf16.mxu0 %v2560_v15  ;;  %2332 = vmatprep.subr.bf16.mxu1 %v2562_v17 }
 0x26d   : > { %2237 = vmatpush3.bf16.msra.mxu0 %v2561_v16  ;;  %2333 = vmatpush3.bf16.msra.mxu1 %v2562_v17  ;;  %v2078_v16 = vld [vmem:[%s3331_s1] ss:$0 sm:$0xff] }
 0x26e   : > { %2334 = vmatprep.subr.bf16.mxu1 %v2563_v18 }
 0x271   : > { %2335 = vmatpush3.bf16.msra.mxu1 %v2563_v18 }
 0x30f   : > { %v2200_v19 = vpop.f32.mrf.mxu0 }
 0x311   : > { %v2201_v20 = vpop.f32.mrf.mxu0 }
 0x312   : > { %v2202_v22 = vadd.f32 %v2201_v20, %v2200_v19 }
 0x313   : > { %v2203_v23 = vpop.f32.mrf.mxu0 }
 0x314   : > { %v2318_v24 = vpop.f32.mrf.mxu1  ;;  %v1425_v27 = vadd.f32 %v2202_v22, %v2053_v21 }
 0x315   : > { %v2204_v35 = vpop.f32.mrf.mxu0 }
 0x316   : > { %v2205_v28 = vadd.f32 %v2204_v35, %v2203_v23  ;;  %v1473_v29 = vpop.f32.mrf.mxu1 }
 0x317   : > { %v1474_v30 = vadd.f32 %v1473_v29, %v1425_v27  ;;  %v2206_v40 = vpop.f32.mrf.mxu0 }
 0x318   : > { %v2319_v31 = vpop.f32.mrf.mxu1  ;;  %v1428_v36 = vadd.f32 %v2205_v28, %v2053_v21 }
 0x319   : > { %vm1488_vm13 = vcmp.gt.f32.partialorder %v1474_v30, 0.0  ;;  %v1492_v32 = vmul.f32 0.1, %v1474_v30  ;;  %v2207_v33 = vpop.f32.mrf.mxu0 }
 0x31a   : > { %v2208_v38 = vadd.f32 %v2207_v33, %v2206_v40  ;;  %v1476_v39 = vpop.f32.mrf.mxu1 }
 0x31b   : > { %v1496_v42 = vsel %vm1488_vm13, %v1474_v30, %v1492_v32  ;;  %v1477_v43 = vadd.f32 %v1476_v39, %v1428_v36  ;;  %v2209_v44 = vpop.f32.mrf.mxu0 }
 0x31c   : > { %v1500_v46 = vsel %vm3079_vm4, %v1496_v42, 0.0  ;;  %v1433_v47 = vadd.f32 %v2208_v38, %v2053_v21 }
 0x31d   : > { %1504 = vst [vmem:[#allocation3 + $0x8] sm:$0xff] %v1500_v46  ;;  %vm1489_vm15 = vcmp.gt.f32.partialorder %v1477_v43, 0.0  ;;  %v1493_v48 = vmul.f32 0.1, %v1477_v43  ;;  %v2210_v50 = vpop.f32.mrf.mxu0 }
 0x31e   : > { %v1482_v51 = vadd.f32 %v2318_v24, %v1433_v47  ;;  %v2211_v41 = vadd.f32 %v2210_v50, %v2209_v44 }
 0x31f   : > { %v1497_v52 = vsel %vm1489_vm15, %v1477_v43, %v1493_v48 }
 0x320   : > { %vm1490_vm2 = vcmp.gt.f32.partialorder %v1482_v51, 0.0  ;;  %v1494_v53 = vmul.f32 0.1, %v1482_v51  ;;  %v1501_v54 = vsel %vm3090_vm9, %v1497_v52, 0.0  ;;  %v1436_v56 = vadd.f32 %v2211_v41, %v2053_v21 }
 0x321   : > { %1505 = vst [vmem:[#allocation3 + $0x10] sm:$0xff] %v1501_v54  ;;  %v2583_v59 = vpack.c.bf16 %v1497_v52, %v1496_v42 }
 0x322   : > { %v1498_v57 = vsel %vm1490_vm2, %v1482_v51, %v1494_v53  ;;  %v1485_v58 = vadd.f32 %v2319_v31, %v1436_v56 }
 0x323   : > { %v1502_v34 = vsel %vm3108_vm12, %v1498_v57, 0.0  ;;  %2584 = vmatprep.mubr.msk.bf16.mxu0 %vm3134_vm0, %v2583_v59 }
 0x324   : > { %1506 = vst [vmem:[#allocation3 + $0x18] sm:$0xff] %v1502_v34  ;;  %vm1491_vm4 = vcmp.gt.f32.partialorder %v1485_v58, 0.0  ;;  %v1495_v60 = vmul.f32 0.1, %v1485_v58  ;;  %v1508_v37 = vld [vmem:[#allocation3 + $0x7] sm:$0xff] }
 0x326   : > { %v1499_v61 = vsel %vm1491_vm4, %v1485_v58, %v1495_v60 }
 0x327   : > { %v1503_v62 = vsel %vm3120_vm14, %v1499_v61, 0.0  ;;  %v2586_v3 = vpack.c.bf16 %v1499_v61, %v1498_v57 }
 0x328   : > { %1507 = vst [vmem:[#allocation3 + $0x20] sm:$0xff] %v1503_v62  ;;  %v1509_v63 = vld [vmem:[#allocation3 + $0xf] sm:$0xff] }
 0x329   : > { %v1512_v0 = vpack.c.bf16 %v1509_v63, %v1508_v37  ;;  %v1520_v1 = vld [vmem:[#allocation3 + $0x9] sm:$0xff] }
 0x32b   : > { %1758 = vmatmul.mubr.bf16.vlgmr.msra.gmra.mxu0 %v1512_v0  ;;  %v1521_v2 = vld [vmem:[#allocation3 + $0x11] sm:$0xff] }
 0x32c   : > { %v1524_v45 = vpack.c.bf16 %v1521_v2, %v1520_v1  ;;  %2587 = vmatprep.mubr.msk.bf16.mxu0 %vm3146_vm1, %v2586_v3  ;;  %v1510_v55 = vld [vmem:[#allocation3 + $0x17] sm:$0xff] }
 0x32e   : > { %2336 = vmatprep.mubr.bf16.mxu1 %v1524_v45 }
 0x32f   : > { %v1522_v4 = vld [vmem:[#allocation3 + $0x19] sm:$0xff]  ;;  %v1523_v49 = vld [vmem:[#allocation3 + $0x21] sm:$0xff] }
 0x330   : > { %v1511_v5 = vld [vmem:[#allocation3 + $0x1f] sm:$0xff]  ;;  %v1525_v7 = vpack.c.bf16 %v1523_v49, %v1522_v4 }
 0x331   : > { %v1513_v8 = vpack.c.bf16 %v1511_v5, %v1510_v55 }
 0x332   : > { %2337 = vmatmul.mubr.bf16.vlgmr.msra.gmra.mxu1 %v1525_v7 }
 0x333   : > { %1766 = vmatmul.mubr.bf16.gmra.mxu0 %v1513_v8 }
 0x3eb   : > { %v2238_v9 = vpop.f32.mrf.mxu0 }
 0x3ed   : > { %v2239_v10 = vpop.f32.mrf.mxu0 }
 0x3ef   : > { %v2241_v11 = vpop.f32.mrf.mxu0 }
 0x3f1   : > { %v2242_v12 = vpop.f32.mrf.mxu0 }
 0x3f2   : > { %v2338_v13 = vpop.f32.mrf.mxu1  ;;  %v2243_v6 = vadd.f32 %v2242_v12, %v2241_v11 }
 0x3f3   : > { %v2244_v14 = vpop.f32.mrf.mxu0 }
 0x3f4   : > { %v1808_v15 = vpop.f32.mrf.mxu1  ;;  %v1763_v21 = vadd.f32 %v2243_v6, %v2078_v16 }
 0x3f5   : > { %v2245_v17 = vpop.f32.mrf.mxu0 }
 0x3f6   : > { %v2246_v18 = vadd.f32 %v2245_v17, %v2244_v14  ;;  %v2339_v19 = vpop.f32.mrf.mxu1 }
 0x3f7   : > { %v2247_v20 = vpop.f32.mrf.mxu0 }
 0x3f8   : > { %v1768_v22 = vadd.f32 %v2246_v18, %v2078_v16  ;;  %v1811_v23 = vpop.f32.mrf.mxu1 }
 0x3f9   : > { %v1812_v24 = vadd.f32 %v1811_v23, %v1763_v21  ;;  %v2248_v27 = vpop.f32.mrf.mxu0 }
 0x3fa   : > { %v1817_v35 = vadd.f32 %v2338_v13, %v1768_v22 }
 0x3fb   : > { %v1828_v28 = vadd.f32 %v1812_v24, %v3175_v26 }
 0x3fc   : > { %v1829_v29 = vadd.f32 %v1817_v35, %v3172_v25 }
 0x3fd   : > { %1837 = vst [vmem:[%s426_s9] sm:$0xff] %v1828_v28 }
 0x3fe   : > { %1838 = vst [vmem:[%s426_s9 + $0x8] sm:$0xff] %v1829_v29 }
 0x3ff   : > { %2733 = shalt.err (!%p2730_p5)
}
 0x400   : > { %s2734_s29 = scalar_lea.hbm %s3224_s21, 256  ;;  %s2738_s25 = scalar_lea.hbm %s3333_s19, 1536 }
 0x401   : > { %p2735_p11 = scmp.ne.s32.totalorder %s3224_s21, %s2734_s29  ;;  %p2739_p9 = scmp.lt.s32.totalorder %s3224_s21, %s3333_s19 }
 0x402   : > { %p2740_p10 = scmp.lt.s32.totalorder %s2738_s25, %s2734_s29 }
 0x403   : > { %p2736_p7 = pnand %p2735_p11, %p3028_p12 }
 0x404   : > { %p2741_p13 = por %p2740_p10, %p2739_p9 }
 0x405   : > { %p2737_p6 = pneg %p2736_p7 }
 0x407   : > { %p2742_p1 = pnand %p2741_p13, %p2737_p6 }
 0x409   : > { %2745 = shalt.err (!%p2742_p1)
}
 0x40a   : > { %s2837_s8 = smov 128   ;;  %s2838_s9 = smov 8  }
 0x40b   : > { %2360 = dma.vmem_to_hbm [thread:$0]  (%p3028_p12), %s3218_s13, 256, %s3224_s21, %s1840_s23, %s2837_s8, %s2837_s8, %s2838_s9  }
 0x40c PF: > { %s3334_s12 = sld [smem:[#allocation19_spill]] }
 0x40d   : > { %s3335_s24 = sld [smem:[#allocation18_spill]] }
 0x40e   : > { %s3336_s3 = sld [smem:[#allocation20_spill]] }
 0x412   : > { %p2392_p4 = scmp.ge.s32.totalorder %s3334_s12, 2 }
 0x413   : > { %s1870_s27 = sand.u32 1, %s3335_s24  }
 0x414   : > { %p3337_p8 = scmp.ne.s32.totalorder %s3336_s3, 0  ;;  %s1871_s18 = scalar_lea.sflag [#allocation6], %s1870_s27 }
 0x416   : > { %p2380_p0 = pnand %p2392_p4, %p3337_p8 }
 0x418   : > { %p2381_p3 = pneg %p2380_p0 }
 0x41a   : > { %2791 = dma.done.wait (%p2381_p3), %s1871_s18, 256  }
 0x41b   : > { %2793 = vsyncadd (%p2381_p3), %s1871_s18, 4294967040  ;;  %s27_s16 = sadd.s32 1, %s3334_s12   ;;  %s3338_s22 = sld [smem:[#allocation21_spill]] }
 0x41c   : > { %p24_p2 = scmp.ge.s32.totalorder %s27_s16, 8   ;;  %s3339_s30 = smov %s2800_s10 }
 0x41d   : > { %s3340_s10 = smov %s2804_s11  ;;  %s3341_s11 = smov %s3047_s4 }
 0x41e   : > { %s3342_s12 = smov %s2816_s14  ;;  %s3343_s13 = smov %s2820_s15 }
 0x41f   : > { %s3345_s15 = smov %s3351_s26  ;;  %26 = sbr.rel (!%p24_p2) target bundleno = 16 (0x10), region = 117 }
 0x421   : > { %s3344_s14 = smov %s3338_s22 }
 0x424   :  { %1876 = vsyncpa [#allocation5], 1 }
 0x425   :  { %1878 = vsyncpa [#allocation5 + $0x1], 1 }
 0x426   :  { %1879 = vsyncpa [#allocation8], 1 }
 0x427   :  { %1880 = vsyncpa [#allocation11], 1 }
 0x428   :  { %1881 = vsyncpa [#allocation6], 1 }
 0x429   :  { %1883 = vsyncpa [#allocation6 + $0x1], 1 }

</bundles_post_ra>
